<compile_context>
chip_gen: v7x
topology: tpu7x:2x2x1
jax: 0.10.0
libtpu: 0.0.40
codegen_flags: <defaults>
</compile_context>

<pallas_src>
import jax
import jax.numpy as jnp
from jax.experimental import pallas as pl
from jax.experimental.pallas import tpu as pltpu


# ---------------------------------------------------------------------------
# Chip-dependent knobs
# ---------------------------------------------------------------------------
def _device_kind():
    try:
        return jax.devices()[0].device_kind.lower()
    except Exception:
        return ""


def _default_elementwise_dtype():
    """bf16 elementwise only where the VPU/EUP are bf16-native (v6e / v7x)."""
    kind = _device_kind()
    if any(tag in kind for tag in ("v6", "v7", "7x", "trillium")):
        return jnp.bfloat16
    return jnp.float32  # v5e and older: no bf16 VPU/EUP -> keep f32 elementwise


def _is_multi_tensorcore():
    kind = _device_kind()
    return any(tag in kind for tag in ("v4", "v5p", "v7", "7x"))


# ---------------------------------------------------------------------------
# Kernel
# ---------------------------------------------------------------------------
def _make_decoder_kernel(ew_dtype, tanh_gelu):
    """Kernel factory: elementwise dtype + GELU flavor fixed at trace time."""

    if tanh_gelu:
        def act(x):
            return jax.nn.gelu(x, approximate=True)     # tanh -> EUP slot
    else:
        def act(x):
            return jax.nn.gelu(x, approximate=False)    # exact erf (PyTorch default)

    def kernel(gi_ref, qc_ref,
               w_pe1, b_pe1, w_pe2, b_pe2,
               w_g, b_g,
               w_d1, b_d1, w_d2, b_d2, w_d3, b_d3, w_d4, b_d4,
               w_out, b_out,
               o_ref):
        """Per-block operands are [C, tile_pixels]: channels on sublanes,
        pixels on lanes.  Weights are [C_out, C_in] bf16, biases [C_out, 1]."""
        f32 = jnp.float32
        bf16 = jnp.bfloat16
        ew = ew_dtype

        # --- position_encoder layer 1: K = coords_dim (tiny) -> VPU FMAs ----
        # (outer products instead of a K=2 MXU matmul; coords kept in f32)
        qc = qc_ref[...].astype(f32)                     # [Cd, T]
        w1 = w_pe1[...].astype(f32)                      # [Cg, Cd]
        pe = w1[:, 0:1] * qc[0:1, :]                     # [Cg, T]
        for k in range(1, w1.shape[1]):
            pe = pe + w1[:, k:k + 1] * qc[k:k + 1, :]
        pe = act(pe.astype(ew) + b_pe1[...])

        # --- position_encoder layer 2 (MXU, f32 accumulation) ---------------
        pe = jnp.dot(w_pe2[...], pe.astype(bf16),
                     preferred_element_type=f32).astype(ew) + b_pe2[...]

        # --- add bilinearly-upsampled global INR -----------------------------
        x = gi_ref[...].astype(ew) + pe                  # [Cg, T]

        def layer(w, b, h):
            y = jnp.dot(w[...], h.astype(bf16), preferred_element_type=f32)
            return act(y.astype(ew) + b[...])

        x = layer(w_g, b_g, x)        # global_inr_con1x1: conv1x1 -> GELU
        x = layer(w_d1, b_d1, x)      # decoding: 4 x (conv1x1 -> GELU)
        x = layer(w_d2, b_d2, x)
        x = layer(w_d3, b_d3, x)
        x = layer(w_d4, b_d4, x)
        x = layer(w_out, b_out, x)    # final conv1x1(hidden -> out) -> GELU

        o_ref[...] = x.astype(o_ref.dtype)

    return kernel


# ---------------------------------------------------------------------------
# Wrapper-side bilinear upsample (separable interp matrices — no gathers)
# ---------------------------------------------------------------------------
def _bilinear_matrix(in_size, out_size, dtype=jnp.float32):
    """Dense [out_size, in_size] matrix reproducing one axis of
    F.interpolate(mode='bilinear', align_corners=False)."""
    if in_size == out_size:
        return jnp.eye(out_size, dtype=dtype)
    scale = in_size / out_size
    src = jnp.maximum(
        (jnp.arange(out_size, dtype=jnp.float32) + 0.5) * scale - 0.5, 0.0)
    i0 = jnp.floor(src).astype(jnp.int32)
    i1 = jnp.minimum(i0 + 1, in_size - 1)
    w1 = src - i0.astype(jnp.float32)
    w0 = 1.0 - w1
    cols = jnp.arange(in_size, dtype=jnp.int32)[None, :]
    m = (w0[:, None] * (cols == i0[:, None]).astype(jnp.float32)
         + w1[:, None] * (cols == i1[:, None]).astype(jnp.float32))
    return m.astype(dtype)


def bilinear_resize_hw(x, out_h, out_w):
    """Gather-based F.interpolate(mode='bilinear', align_corners=False) over
    the last two dims.  Used only by the pure-JAX correctness reference."""
    H, W = x.shape[-2], x.shape[-1]
    if (H, W) == (out_h, out_w):
        return x
    scale_h = H / out_h
    scale_w = W / out_w
    ys = jnp.maximum((jnp.arange(out_h, dtype=jnp.float32) + 0.5) * scale_h - 0.5, 0.0)
    xs = jnp.maximum((jnp.arange(out_w, dtype=jnp.float32) + 0.5) * scale_w - 0.5, 0.0)
    y0 = jnp.floor(ys).astype(jnp.int32)
    x0 = jnp.floor(xs).astype(jnp.int32)
    y1 = jnp.minimum(y0 + 1, H - 1)
    x1 = jnp.minimum(x0 + 1, W - 1)
    wy1 = ys - y0.astype(jnp.float32)
    wx1 = xs - x0.astype(jnp.float32)
    wy0 = 1.0 - wy1
    wx0 = 1.0 - wx1

    def g(yi, xi):
        return x[..., yi[:, None], xi[None, :]]

    return (wy0[:, None] * wx0[None, :] * g(y0, x0)
            + wy0[:, None] * wx1[None, :] * g(y0, x1)
            + wy1[:, None] * wx0[None, :] * g(y1, x0)
            + wy1[:, None] * wx1[None, :] * g(y1, x1))


# ---------------------------------------------------------------------------
# Parameters
# ---------------------------------------------------------------------------
# Order must match the kernel signature.
WEIGHT_KEYS = ("w_pe1", "b_pe1", "w_pe2", "b_pe2",
               "w_g", "b_g",
               "w_d1", "b_d1", "w_d2", "b_d2",
               "w_d3", "b_d3", "w_d4", "b_d4",
               "w_out", "b_out")


def init_params(key, coords_dim, global_inr_channel, local_inr_channel,
                hidden_channels, out_channels):
    """Deterministic synthetic weights.

    Conv2d(kernel_size=1) weight [C_out, C_in, 1, 1] is stored in matmul form
    [C_in, C_out]; biases as [1, C_out].
    (local_inr_channel / event_tree_con1x1 is unused by forward -> skipped.)
    """
    shapes = {
        "w_pe1": (coords_dim, global_inr_channel),
        "w_pe2": (global_inr_channel, global_inr_channel),
        "w_g": (global_inr_channel, hidden_channels),
        "w_d1": (hidden_channels, hidden_channels),
        "w_d2": (hidden_channels, hidden_channels),
        "w_d3": (hidden_channels, hidden_channels),
        "w_d4": (hidden_channels, hidden_channels),
        "w_out": (hidden_channels, out_channels),
    }
    params = {}
    keys = jax.random.split(key, 2 * len(shapes))
    for idx, (wname, shp) in enumerate(shapes.items()):
        bname = "b_" + wname[2:]
        params[wname] = 0.2 * jax.random.normal(keys[2 * idx], shp, jnp.float32)
        params[bname] = 0.1 * jax.random.normal(keys[2 * idx + 1], (1, shp[1]), jnp.float32)
    return params


def _round_up(x, m):
    return ((x + m - 1) // m) * m


# ---------------------------------------------------------------------------
# Forward
# ---------------------------------------------------------------------------
def vfisr_decoder_forward(params, global_inr, query_coords, out_resolution,
                          tile_pixels=4096, tanh_gelu=True,
                          elementwise_dtype=None):
    sr_h, sr_w = out_resolution
    B, Cg, in_h, in_w = global_inr.shape
    Bq, Cd, qh, qw = query_coords.shape
    assert Bq == B and (qh, qw) == (sr_h, sr_w)
    pix = sr_h * sr_w

    ew = elementwise_dtype if elementwise_dtype is not None else _default_elementwise_dtype()

    # ---- bilinear upsample via separable interp matrices (no gathers) ------
    # Output lands directly in the kernel layout [B, Cg, H*W]; no transposes.
    ay = _bilinear_matrix(in_h, sr_h)                      # [H, h]
    ax = _bilinear_matrix(in_w, sr_w)                      # [W, w]
    gi_up = jnp.einsum("Hh,bchw,Ww->bcHW",
                       ay, global_inr.astype(jnp.float32), ax)
    gi = gi_up.reshape(B, Cg, pix).astype(jnp.bfloat16)

    # query_coords stay f32 in HBM (only 2 channels; coordinate precision).
    qc = query_coords.astype(jnp.float32).reshape(B, Cd, pix)

    # ---- tile / grid selection ----------------------------------------------
    tile = max(128, min(int(tile_pixels), _round_up(pix, 128)))
    tile = _round_up(tile, 128)
    # Keep >= ~8 total grid steps (megacore balance) when the problem allows.
    while B * pl.cdiv(pix, tile) < 8 and tile > 128:
        tile = max(128, _round_up(tile // 2, 128))
    pix_pad = _round_up(pix, tile)
    n_tiles = pix_pad // tile
    # Multi-TensorCore parts: keep an even per-batch tile count when the extra
    # padded tile costs little (<~15% of the work).
    if _is_multi_tensorcore() and n_tiles % 2 == 1 and n_tiles >= 7:
        n_tiles += 1
        pix_pad += tile

    if pix_pad != pix:
        pad = pix_pad - pix
        gi = jnp.pad(gi, ((0, 0), (0, 0), (0, pad)))
        qc = jnp.pad(qc, ((0, 0), (0, 0), (0, pad)))

    grid = (B, n_tiles)

    # ---- weights: [C_out, C_in] bf16; biases: [C_out, 1] in elementwise dtype
    weight_args = []
    for k in WEIGHT_KEYS:
        v = params[k]
        if k.startswith("w_"):
            weight_args.append(jnp.transpose(v).astype(jnp.bfloat16))
        else:
            weight_args.append(jnp.transpose(v).astype(ew))
    c_out = params["w_out"].shape[1]

    def io_spec(c):
        # [B, C, pix] -> kernel block [C, tile] (batch dim squeezed).
        return pl.BlockSpec((None, c, tile), lambda b, i: (b, 0, i))

    def w_spec(arr):
        return pl.BlockSpec(arr.shape, lambda b, i: (0, 0))

    kernel = _make_decoder_kernel(ew, tanh_gelu)

    out_pc = pl.pallas_call(
        kernel,
        out_shape=jax.ShapeDtypeStruct((B, c_out, pix_pad), jnp.float32),
        grid_spec=pltpu.PrefetchScalarGridSpec(
            num_scalar_prefetch=0,
            grid=grid,
            in_specs=[io_spec(Cg), io_spec(Cd)]
                     + [w_spec(w) for w in weight_args],
            out_specs=io_spec(c_out),
        ),
        compiler_params=pltpu.CompilerParams(
            dimension_semantics=("parallel", "parallel")),
    )(gi, qc, *weight_args)

    # Output already in NC(HW) order: just drop pixel padding and reshape.
    return out_pc[:, :, :pix].reshape(B, c_out, sr_h, sr_w)


# ---------------------------------------------------------------------------
# Pure-JAX f32 reference (matches the PyTorch forward, exact-erf GELU)
# ---------------------------------------------------------------------------
def vfisr_decoder_reference(params, global_inr, query_coords, out_resolution):
    sr_h, sr_w = out_resolution
    gi = bilinear_resize_hw(global_inr.astype(jnp.float32), sr_h, sr_w)
    gi = jnp.transpose(gi, (0, 2, 3, 1))                      # NHWC
    qc = jnp.transpose(query_coords.astype(jnp.float32), (0, 2, 3, 1))

    def gelu(x):
        return jax.nn.gelu(x, approximate=False)

    def lin(x, w, b):
        return jnp.einsum("bhwc,cd->bhwd", x, w) + b[0]

    pe = gelu(lin(qc, params["w_pe1"], params["b_pe1"]))
    pe = lin(pe, params["w_pe2"], params["b_pe2"])
    x = gi + pe
    x = gelu(lin(x, params["w_g"], params["b_g"]))
    x = gelu(lin(x, params["w_d1"], params["b_d1"]))
    x = gelu(lin(x, params["w_d2"], params["b_d2"]))
    x = gelu(lin(x, params["w_d3"], params["b_d3"]))
    x = gelu(lin(x, params["w_d4"], params["b_d4"]))
    x = gelu(lin(x, params["w_out"], params["b_out"]))
    return jnp.transpose(x, (0, 3, 1, 2))


if __name__ == "__main__":
    # Module hyper-parameters (small, consistent with the forward pass).
    coords_dim = 2
    global_inr_channel = 16
    local_inr_channel = 16   # unused by forward (event_tree_con1x1 never called)
    hidden_channels = 32
    out_channels = 4

    batch = 2
    in_h, in_w = 8, 8          # low-res global INR spatial size
    sr_h, sr_w = 16, 16        # out_resolution

    key = jax.random.PRNGKey(0)
    kp, kg, kq = jax.random.split(key, 3)

    params = init_params(kp, coords_dim, global_inr_channel, local_inr_channel,
                         hidden_channels, out_channels)

    global_inr = jax.random.normal(kg, (batch, global_inr_channel, in_h, in_w),
                                   jnp.float32)
    query_coords = jax.random.normal(kq, (batch, coords_dim, sr_h, sr_w),
                                     jnp.float32)

    out = vfisr_decoder_forward(params, global_inr, query_coords, (sr_h, sr_w))
    out = jax.block_until_ready(out)
    assert out.shape == (batch, out_channels, sr_h, sr_w), out.shape

    ref = jax.block_until_ready(
        vfisr_decoder_reference(params, global_inr, query_coords, (sr_h, sr_w)))
    err = jnp.max(jnp.abs(out - ref))
    scale = jnp.max(jnp.abs(ref)) + 1e-6
    # bf16 operands (+ tanh-GELU, bf16 elementwise on v6e/v7x) vs f32/erf
    # reference -> relaxed relative tolerance.
    assert float(err / scale) < 5e-2, f"relative err {float(err / scale)}"

    print("KERNEL_OK")
</pallas_src>

<mosaic_0001>
module attributes {stable_mosaic.version = 11 : i64} {
  func.func @kernel(%arg0: i32, %arg1: i32, %arg2: memref<1x16x128xbf16, #tpu.memory_space<vmem>>, %arg3: memref<1x2x128xf32, #tpu.memory_space<vmem>>, %arg4: memref<16x2xbf16, #tpu.memory_space<vmem>>, %arg5: memref<16x1xf32, #tpu.memory_space<vmem>>, %arg6: memref<16x16xbf16, #tpu.memory_space<vmem>>, %arg7: memref<16x1xf32, #tpu.memory_space<vmem>>, %arg8: memref<32x16xbf16, #tpu.memory_space<vmem>>, %arg9: memref<32x1xf32, #tpu.memory_space<vmem>>, %arg10: memref<32x32xbf16, #tpu.memory_space<vmem>>, %arg11: memref<32x1xf32, #tpu.memory_space<vmem>>, %arg12: memref<32x32xbf16, #tpu.memory_space<vmem>>, %arg13: memref<32x1xf32, #tpu.memory_space<vmem>>, %arg14: memref<32x32xbf16, #tpu.memory_space<vmem>>, %arg15: memref<32x1xf32, #tpu.memory_space<vmem>>, %arg16: memref<32x32xbf16, #tpu.memory_space<vmem>>, %arg17: memref<32x1xf32, #tpu.memory_space<vmem>>, %arg18: memref<4x32xbf16, #tpu.memory_space<vmem>>, %arg19: memref<4x1xf32, #tpu.memory_space<vmem>>, %arg20: memref<1x4x128xf32, #tpu.memory_space<vmem>>) attributes {dimension_semantics = [#tpu.dimension_semantics<parallel>, #tpu.dimension_semantics<parallel>], iteration_bounds = array<i64: 2, 2>, scalar_prefetch = 0 : i64, scratch_operands = 0 : i64, tpu.core_type = #tpu.core_type<tc>, window_params = [{transform_indices = @transform_0, window_bounds = array<i64: 1, 16, 128>}, {transform_indices = @transform_1, window_bounds = array<i64: 1, 2, 128>}, {pipeline_mode = #tpu.pipeline_mode<synchronous>, transform_indices = @transform_2, window_bounds = array<i64: 16, 2>}, {pipeline_mode = #tpu.pipeline_mode<synchronous>, transform_indices = @transform_3, window_bounds = array<i64: 16, 1>}, {pipeline_mode = #tpu.pipeline_mode<synchronous>, transform_indices = @transform_4, window_bounds = array<i64: 16, 16>}, {pipeline_mode = #tpu.pipeline_mode<synchronous>, transform_indices = @transform_5, window_bounds = array<i64: 16, 1>}, {pipeline_mode = #tpu.pipeline_mode<synchronous>, transform_indices = @transform_6, window_bounds = array<i64: 32, 16>}, {pipeline_mode = #tpu.pipeline_mode<synchronous>, transform_indices = @transform_7, window_bounds = array<i64: 32, 1>}, {pipeline_mode = #tpu.pipeline_mode<synchronous>, transform_indices = @transform_8, window_bounds = array<i64: 32, 32>}, {pipeline_mode = #tpu.pipeline_mode<synchronous>, transform_indices = @transform_9, window_bounds = array<i64: 32, 1>}, {pipeline_mode = #tpu.pipeline_mode<synchronous>, transform_indices = @transform_10, window_bounds = array<i64: 32, 32>}, {pipeline_mode = #tpu.pipeline_mode<synchronous>, transform_indices = @transform_11, window_bounds = array<i64: 32, 1>}, {pipeline_mode = #tpu.pipeline_mode<synchronous>, transform_indices = @transform_12, window_bounds = array<i64: 32, 32>}, {pipeline_mode = #tpu.pipeline_mode<synchronous>, transform_indices = @transform_13, window_bounds = array<i64: 32, 1>}, {pipeline_mode = #tpu.pipeline_mode<synchronous>, transform_indices = @transform_14, window_bounds = array<i64: 32, 32>}, {pipeline_mode = #tpu.pipeline_mode<synchronous>, transform_indices = @transform_15, window_bounds = array<i64: 32, 1>}, {pipeline_mode = #tpu.pipeline_mode<synchronous>, transform_indices = @transform_16, window_bounds = array<i64: 4, 32>}, {pipeline_mode = #tpu.pipeline_mode<synchronous>, transform_indices = @transform_17, window_bounds = array<i64: 4, 1>}, {transform_indices = @transform_18, window_bounds = array<i64: 1, 4, 128>}]} {
    %c0 = arith.constant 0 : index
    %c0_0 = arith.constant 0 : index
    %c0_1 = arith.constant 0 : index
    %0 = vector.load %arg3[%c0, %c0_0, %c0_1] : memref<1x2x128xf32, #tpu.memory_space<vmem>>, vector<1x2x128xf32>
    %1 = vector.shape_cast %0 : vector<1x2x128xf32> to vector<2x128xf32>
    %c0_2 = arith.constant 0 : index
    %c0_3 = arith.constant 0 : index
    %2 = vector.load %arg4[%c0_2, %c0_3] : memref<16x2xbf16, #tpu.memory_space<vmem>>, vector<16x2xbf16>
    %3 = arith.extf %2 : vector<16x2xbf16> to vector<16x2xf32>
    %4 = vector.extract_strided_slice %3 {offsets = [0, 0], sizes = [16, 1], strides = [1, 1]} : vector<16x2xf32> to vector<16x1xf32>
    %5 = vector.extract_strided_slice %1 {offsets = [0, 0], sizes = [1, 128], strides = [1, 1]} : vector<2x128xf32> to vector<1x128xf32>
    %6 = vector.broadcast %4 : vector<16x1xf32> to vector<16x128xf32>
    %7 = vector.broadcast %5 : vector<1x128xf32> to vector<16x128xf32>
    %8 = arith.mulf %6, %7 : vector<16x128xf32>
    %9 = vector.extract_strided_slice %3 {offsets = [0, 1], sizes = [16, 1], strides = [1, 1]} : vector<16x2xf32> to vector<16x1xf32>
    %10 = vector.extract_strided_slice %1 {offsets = [1, 0], sizes = [1, 128], strides = [1, 1]} : vector<2x128xf32> to vector<1x128xf32>
    %11 = vector.broadcast %9 : vector<16x1xf32> to vector<16x128xf32>
    %12 = vector.broadcast %10 : vector<1x128xf32> to vector<16x128xf32>
    %13 = arith.mulf %11, %12 : vector<16x128xf32>
    %14 = arith.addf %8, %13 : vector<16x128xf32>
    %c0_4 = arith.constant 0 : index
    %c0_5 = arith.constant 0 : index
    %15 = vector.load %arg5[%c0_4, %c0_5] : memref<16x1xf32, #tpu.memory_space<vmem>>, vector<16x1xf32>
    %16 = vector.broadcast %15 : vector<16x1xf32> to vector<16x128xf32>
    %17 = arith.addf %14, %16 : vector<16x128xf32>
    %18 = arith.mulf %17, %17 : vector<16x128xf32>
    %19 = arith.mulf %17, %18 : vector<16x128xf32>
    %cst = arith.constant 4.471500e-02 : f32
    %20 = vector.broadcast %cst : f32 to vector<16x128xf32>
    %21 = arith.mulf %20, %19 : vector<16x128xf32>
    %22 = arith.addf %17, %21 : vector<16x128xf32>
    %cst_6 = arith.constant 0.797884583 : f32
    %23 = vector.broadcast %cst_6 : f32 to vector<16x128xf32>
    %24 = arith.mulf %23, %22 : vector<16x128xf32>
    %25 = math.tanh %24 : vector<16x128xf32>
    %cst_7 = arith.constant 1.000000e+00 : f32
    %26 = vector.broadcast %cst_7 : f32 to vector<16x128xf32>
    %27 = arith.addf %26, %25 : vector<16x128xf32>
    %cst_8 = arith.constant 5.000000e-01 : f32
    %28 = vector.broadcast %cst_8 : f32 to vector<16x128xf32>
    %29 = arith.mulf %28, %27 : vector<16x128xf32>
    %30 = arith.mulf %17, %29 : vector<16x128xf32>
    %c0_9 = arith.constant 0 : index
    %c0_10 = arith.constant 0 : index
    %31 = vector.load %arg6[%c0_9, %c0_10] : memref<16x16xbf16, #tpu.memory_space<vmem>>, vector<16x16xbf16>
    %32 = arith.truncf %30 : vector<16x128xf32> to vector<16x128xbf16>
    %cst_11 = arith.constant dense<0.000000e+00> : vector<16x128xf32>
    %33 = tpu.matmul %31, %32, %cst_11 {dimension_numbers = #tpu.dot_dimension_numbers<[1], [0], [0], [1], [0, 0, 1, 1], [], []>} : vector<16x16xbf16>, vector<16x128xbf16>, vector<16x128xf32> -> vector<16x128xf32>
    %c0_12 = arith.constant 0 : index
    %c0_13 = arith.constant 0 : index
    %34 = vector.load %arg7[%c0_12, %c0_13] : memref<16x1xf32, #tpu.memory_space<vmem>>, vector<16x1xf32>
    %35 = vector.broadcast %34 : vector<16x1xf32> to vector<16x128xf32>
    %36 = arith.addf %33, %35 : vector<16x128xf32>
    %c0_14 = arith.constant 0 : index
    %c0_15 = arith.constant 0 : index
    %c0_16 = arith.constant 0 : index
    %37 = vector.load %arg2[%c0_14, %c0_15, %c0_16] : memref<1x16x128xbf16, #tpu.memory_space<vmem>>, vector<1x16x128xbf16>
    %38 = vector.shape_cast %37 : vector<1x16x128xbf16> to vector<16x128xbf16>
    %39 = arith.extf %38 : vector<16x128xbf16> to vector<16x128xf32>
    %40 = arith.addf %39, %36 : vector<16x128xf32>
    %c0_17 = arith.constant 0 : index
    %c0_18 = arith.constant 0 : index
    %41 = vector.load %arg8[%c0_17, %c0_18] : memref<32x16xbf16, #tpu.memory_space<vmem>>, vector<32x16xbf16>
    %42 = arith.truncf %40 : vector<16x128xf32> to vector<16x128xbf16>
    %cst_19 = arith.constant dense<0.000000e+00> : vector<32x128xf32>
    %43 = tpu.matmul %41, %42, %cst_19 {dimension_numbers = #tpu.dot_dimension_numbers<[1], [0], [0], [1], [0, 0, 1, 1], [], []>} : vector<32x16xbf16>, vector<16x128xbf16>, vector<32x128xf32> -> vector<32x128xf32>
    %c0_20 = arith.constant 0 : index
    %c0_21 = arith.constant 0 : index
    %44 = vector.load %arg9[%c0_20, %c0_21] : memref<32x1xf32, #tpu.memory_space<vmem>>, vector<32x1xf32>
    %45 = vector.broadcast %44 : vector<32x1xf32> to vector<32x128xf32>
    %46 = arith.addf %43, %45 : vector<32x128xf32>
    %47 = arith.mulf %46, %46 : vector<32x128xf32>
    %48 = arith.mulf %46, %47 : vector<32x128xf32>
    %cst_22 = arith.constant 4.471500e-02 : f32
    %49 = vector.broadcast %cst_22 : f32 to vector<32x128xf32>
    %50 = arith.mulf %49, %48 : vector<32x128xf32>
    %51 = arith.addf %46, %50 : vector<32x128xf32>
    %cst_23 = arith.constant 0.797884583 : f32
    %52 = vector.broadcast %cst_23 : f32 to vector<32x128xf32>
    %53 = arith.mulf %52, %51 : vector<32x128xf32>
    %54 = math.tanh %53 : vector<32x128xf32>
    %cst_24 = arith.constant 1.000000e+00 : f32
    %55 = vector.broadcast %cst_24 : f32 to vector<32x128xf32>
    %56 = arith.addf %55, %54 : vector<32x128xf32>
    %cst_25 = arith.constant 5.000000e-01 : f32
    %57 = vector.broadcast %cst_25 : f32 to vector<32x128xf32>
    %58 = arith.mulf %57, %56 : vector<32x128xf32>
    %59 = arith.mulf %46, %58 : vector<32x128xf32>
    %c0_26 = arith.constant 0 : index
    %c0_27 = arith.constant 0 : index
    %60 = vector.load %arg10[%c0_26, %c0_27] : memref<32x32xbf16, #tpu.memory_space<vmem>>, vector<32x32xbf16>
    %61 = arith.truncf %59 : vector<32x128xf32> to vector<32x128xbf16>
    %cst_28 = arith.constant dense<0.000000e+00> : vector<32x128xf32>
    %62 = tpu.matmul %60, %61, %cst_28 {dimension_numbers = #tpu.dot_dimension_numbers<[1], [0], [0], [1], [0, 0, 1, 1], [], []>} : vector<32x32xbf16>, vector<32x128xbf16>, vector<32x128xf32> -> vector<32x128xf32>
    %c0_29 = arith.constant 0 : index
    %c0_30 = arith.constant 0 : index
    %63 = vector.load %arg11[%c0_29, %c0_30] : memref<32x1xf32, #tpu.memory_space<vmem>>, vector<32x1xf32>
    %64 = vector.broadcast %63 : vector<32x1xf32> to vector<32x128xf32>
    %65 = arith.addf %62, %64 : vector<32x128xf32>
    %66 = arith.mulf %65, %65 : vector<32x128xf32>
    %67 = arith.mulf %65, %66 : vector<32x128xf32>
    %cst_31 = arith.constant 4.471500e-02 : f32
    %68 = vector.broadcast %cst_31 : f32 to vector<32x128xf32>
    %69 = arith.mulf %68, %67 : vector<32x128xf32>
    %70 = arith.addf %65, %69 : vector<32x128xf32>
    %cst_32 = arith.constant 0.797884583 : f32
    %71 = vector.broadcast %cst_32 : f32 to vector<32x128xf32>
    %72 = arith.mulf %71, %70 : vector<32x128xf32>
    %73 = math.tanh %72 : vector<32x128xf32>
    %cst_33 = arith.constant 1.000000e+00 : f32
    %74 = vector.broadcast %cst_33 : f32 to vector<32x128xf32>
    %75 = arith.addf %74, %73 : vector<32x128xf32>
    %cst_34 = arith.constant 5.000000e-01 : f32
    %76 = vector.broadcast %cst_34 : f32 to vector<32x128xf32>
    %77 = arith.mulf %76, %75 : vector<32x128xf32>
    %78 = arith.mulf %65, %77 : vector<32x128xf32>
    %c0_35 = arith.constant 0 : index
    %c0_36 = arith.constant 0 : index
    %79 = vector.load %arg12[%c0_35, %c0_36] : memref<32x32xbf16, #tpu.memory_space<vmem>>, vector<32x32xbf16>
    %80 = arith.truncf %78 : vector<32x128xf32> to vector<32x128xbf16>
    %cst_37 = arith.constant dense<0.000000e+00> : vector<32x128xf32>
    %81 = tpu.matmul %79, %80, %cst_37 {dimension_numbers = #tpu.dot_dimension_numbers<[1], [0], [0], [1], [0, 0, 1, 1], [], []>} : vector<32x32xbf16>, vector<32x128xbf16>, vector<32x128xf32> -> vector<32x128xf32>
    %c0_38 = arith.constant 0 : index
    %c0_39 = arith.constant 0 : index
    %82 = vector.load %arg13[%c0_38, %c0_39] : memref<32x1xf32, #tpu.memory_space<vmem>>, vector<32x1xf32>
    %83 = vector.broadcast %82 : vector<32x1xf32> to vector<32x128xf32>
    %84 = arith.addf %81, %83 : vector<32x128xf32>
    %85 = arith.mulf %84, %84 : vector<32x128xf32>
    %86 = arith.mulf %84, %85 : vector<32x128xf32>
    %cst_40 = arith.constant 4.471500e-02 : f32
    %87 = vector.broadcast %cst_40 : f32 to vector<32x128xf32>
    %88 = arith.mulf %87, %86 : vector<32x128xf32>
    %89 = arith.addf %84, %88 : vector<32x128xf32>
    %cst_41 = arith.constant 0.797884583 : f32
    %90 = vector.broadcast %cst_41 : f32 to vector<32x128xf32>
    %91 = arith.mulf %90, %89 : vector<32x128xf32>
    %92 = math.tanh %91 : vector<32x128xf32>
    %cst_42 = arith.constant 1.000000e+00 : f32
    %93 = vector.broadcast %cst_42 : f32 to vector<32x128xf32>
    %94 = arith.addf %93, %92 : vector<32x128xf32>
    %cst_43 = arith.constant 5.000000e-01 : f32
    %95 = vector.broadcast %cst_43 : f32 to vector<32x128xf32>
    %96 = arith.mulf %95, %94 : vector<32x128xf32>
    %97 = arith.mulf %84, %96 : vector<32x128xf32>
    %c0_44 = arith.constant 0 : index
    %c0_45 = arith.constant 0 : index
    %98 = vector.load %arg14[%c0_44, %c0_45] : memref<32x32xbf16, #tpu.memory_space<vmem>>, vector<32x32xbf16>
    %99 = arith.truncf %97 : vector<32x128xf32> to vector<32x128xbf16>
    %cst_46 = arith.constant dense<0.000000e+00> : vector<32x128xf32>
    %100 = tpu.matmul %98, %99, %cst_46 {dimension_numbers = #tpu.dot_dimension_numbers<[1], [0], [0], [1], [0, 0, 1, 1], [], []>} : vector<32x32xbf16>, vector<32x128xbf16>, vector<32x128xf32> -> vector<32x128xf32>
    %c0_47 = arith.constant 0 : index
    %c0_48 = arith.constant 0 : index
    %101 = vector.load %arg15[%c0_47, %c0_48] : memref<32x1xf32, #tpu.memory_space<vmem>>, vector<32x1xf32>
    %102 = vector.broadcast %101 : vector<32x1xf32> to vector<32x128xf32>
    %103 = arith.addf %100, %102 : vector<32x128xf32>
    %104 = arith.mulf %103, %103 : vector<32x128xf32>
    %105 = arith.mulf %103, %104 : vector<32x128xf32>
    %cst_49 = arith.constant 4.471500e-02 : f32
    %106 = vector.broadcast %cst_49 : f32 to vector<32x128xf32>
    %107 = arith.mulf %106, %105 : vector<32x128xf32>
    %108 = arith.addf %103, %107 : vector<32x128xf32>
    %cst_50 = arith.constant 0.797884583 : f32
    %109 = vector.broadcast %cst_50 : f32 to vector<32x128xf32>
    %110 = arith.mulf %109, %108 : vector<32x128xf32>
    %111 = math.tanh %110 : vector<32x128xf32>
    %cst_51 = arith.constant 1.000000e+00 : f32
    %112 = vector.broadcast %cst_51 : f32 to vector<32x128xf32>
    %113 = arith.addf %112, %111 : vector<32x128xf32>
    %cst_52 = arith.constant 5.000000e-01 : f32
    %114 = vector.broadcast %cst_52 : f32 to vector<32x128xf32>
    %115 = arith.mulf %114, %113 : vector<32x128xf32>
    %116 = arith.mulf %103, %115 : vector<32x128xf32>
    %c0_53 = arith.constant 0 : index
    %c0_54 = arith.constant 0 : index
    %117 = vector.load %arg16[%c0_53, %c0_54] : memref<32x32xbf16, #tpu.memory_space<vmem>>, vector<32x32xbf16>
    %118 = arith.truncf %116 : vector<32x128xf32> to vector<32x128xbf16>
    %cst_55 = arith.constant dense<0.000000e+00> : vector<32x128xf32>
    %119 = tpu.matmul %117, %118, %cst_55 {dimension_numbers = #tpu.dot_dimension_numbers<[1], [0], [0], [1], [0, 0, 1, 1], [], []>} : vector<32x32xbf16>, vector<32x128xbf16>, vector<32x128xf32> -> vector<32x128xf32>
    %c0_56 = arith.constant 0 : index
    %c0_57 = arith.constant 0 : index
    %120 = vector.load %arg17[%c0_56, %c0_57] : memref<32x1xf32, #tpu.memory_space<vmem>>, vector<32x1xf32>
    %121 = vector.broadcast %120 : vector<32x1xf32> to vector<32x128xf32>
    %122 = arith.addf %119, %121 : vector<32x128xf32>
    %123 = arith.mulf %122, %122 : vector<32x128xf32>
    %124 = arith.mulf %122, %123 : vector<32x128xf32>
    %cst_58 = arith.constant 4.471500e-02 : f32
    %125 = vector.broadcast %cst_58 : f32 to vector<32x128xf32>
    %126 = arith.mulf %125, %124 : vector<32x128xf32>
    %127 = arith.addf %122, %126 : vector<32x128xf32>
    %cst_59 = arith.constant 0.797884583 : f32
    %128 = vector.broadcast %cst_59 : f32 to vector<32x128xf32>
    %129 = arith.mulf %128, %127 : vector<32x128xf32>
    %130 = math.tanh %129 : vector<32x128xf32>
    %cst_60 = arith.constant 1.000000e+00 : f32
    %131 = vector.broadcast %cst_60 : f32 to vector<32x128xf32>
    %132 = arith.addf %131, %130 : vector<32x128xf32>
    %cst_61 = arith.constant 5.000000e-01 : f32
    %133 = vector.broadcast %cst_61 : f32 to vector<32x128xf32>
    %134 = arith.mulf %133, %132 : vector<32x128xf32>
    %135 = arith.mulf %122, %134 : vector<32x128xf32>
    %c0_62 = arith.constant 0 : index
    %c0_63 = arith.constant 0 : index
    %136 = vector.load %arg18[%c0_62, %c0_63] : memref<4x32xbf16, #tpu.memory_space<vmem>>, vector<4x32xbf16>
    %137 = arith.truncf %135 : vector<32x128xf32> to vector<32x128xbf16>
    %cst_64 = arith.constant dense<0.000000e+00> : vector<4x128xf32>
    %138 = tpu.matmul %136, %137, %cst_64 {dimension_numbers = #tpu.dot_dimension_numbers<[1], [0], [0], [1], [0, 0, 1, 1], [], []>} : vector<4x32xbf16>, vector<32x128xbf16>, vector<4x128xf32> -> vector<4x128xf32>
    %c0_65 = arith.constant 0 : index
    %c0_66 = arith.constant 0 : index
    %139 = vector.load %arg19[%c0_65, %c0_66] : memref<4x1xf32, #tpu.memory_space<vmem>>, vector<4x1xf32>
    %140 = vector.broadcast %139 : vector<4x1xf32> to vector<4x128xf32>
    %141 = arith.addf %138, %140 : vector<4x128xf32>
    %142 = arith.mulf %141, %141 : vector<4x128xf32>
    %143 = arith.mulf %141, %142 : vector<4x128xf32>
    %cst_67 = arith.constant 4.471500e-02 : f32
    %144 = vector.broadcast %cst_67 : f32 to vector<4x128xf32>
    %145 = arith.mulf %144, %143 : vector<4x128xf32>
    %146 = arith.addf %141, %145 : vector<4x128xf32>
    %cst_68 = arith.constant 0.797884583 : f32
    %147 = vector.broadcast %cst_68 : f32 to vector<4x128xf32>
    %148 = arith.mulf %147, %146 : vector<4x128xf32>
    %149 = math.tanh %148 : vector<4x128xf32>
    %cst_69 = arith.constant 1.000000e+00 : f32
    %150 = vector.broadcast %cst_69 : f32 to vector<4x128xf32>
    %151 = arith.addf %150, %149 : vector<4x128xf32>
    %cst_70 = arith.constant 5.000000e-01 : f32
    %152 = vector.broadcast %cst_70 : f32 to vector<4x128xf32>
    %153 = arith.mulf %152, %151 : vector<4x128xf32>
    %154 = arith.mulf %141, %153 : vector<4x128xf32>
    %c0_71 = arith.constant 0 : index
    %c0_72 = arith.constant 0 : index
    %c0_73 = arith.constant 0 : index
    %155 = vector.load %arg20[%c0_71, %c0_72, %c0_73] : memref<1x4x128xf32, #tpu.memory_space<vmem>>, vector<1x4x128xf32>
    %156 = vector.shape_cast %155 : vector<1x4x128xf32> to vector<4x128xf32>
    %157 = vector.shape_cast %154 : vector<4x128xf32> to vector<1x4x128xf32>
    tpu.vector_store %arg20[%c0_71, %c0_72, %c0_73], %157 {strides = array<i32>} : memref<1x4x128xf32, #tpu.memory_space<vmem>>, vector<1x4x128xf32>,
    return
  }
  func.func @transform_0(%arg0: i32, %arg1: i32) -> (i32, i32, i32) {
    %c0_i32 = arith.constant 0 : i32
    %c0_i32_0 = arith.constant 0 : i32
    return %arg0, %c0_i32, %arg1 : i32, i32, i32
  }
  func.func @transform_1(%arg0: i32, %arg1: i32) -> (i32, i32, i32) {
    %c0_i32 = arith.constant 0 : i32
    %c0_i32_0 = arith.constant 0 : i32
    return %arg0, %c0_i32, %arg1 : i32, i32, i32
  }
  func.func @transform_2(%arg0: i32, %arg1: i32) -> (i32, i32) {
    %c0_i32 = arith.constant 0 : i32
    %c0_i32_0 = arith.constant 0 : i32
    %c0_i32_1 = arith.constant 0 : i32
    return %c0_i32, %c0_i32_0 : i32, i32
  }
  func.func @transform_3(%arg0: i32, %arg1: i32) -> (i32, i32) {
    %c0_i32 = arith.constant 0 : i32
    %c0_i32_0 = arith.constant 0 : i32
    %c0_i32_1 = arith.constant 0 : i32
    return %c0_i32, %c0_i32_0 : i32, i32
  }
  func.func @transform_4(%arg0: i32, %arg1: i32) -> (i32, i32) {
    %c0_i32 = arith.constant 0 : i32
    %c0_i32_0 = arith.constant 0 : i32
    %c0_i32_1 = arith.constant 0 : i32
    return %c0_i32, %c0_i32_0 : i32, i32
  }
  func.func @transform_5(%arg0: i32, %arg1: i32) -> (i32, i32) {
    %c0_i32 = arith.constant 0 : i32
    %c0_i32_0 = arith.constant 0 : i32
    %c0_i32_1 = arith.constant 0 : i32
    return %c0_i32, %c0_i32_0 : i32, i32
  }
  func.func @transform_6(%arg0: i32, %arg1: i32) -> (i32, i32) {
    %c0_i32 = arith.constant 0 : i32
    %c0_i32_0 = arith.constant 0 : i32
    %c0_i32_1 = arith.constant 0 : i32
    return %c0_i32, %c0_i32_0 : i32, i32
  }
  func.func @transform_7(%arg0: i32, %arg1: i32) -> (i32, i32) {
    %c0_i32 = arith.constant 0 : i32
    %c0_i32_0 = arith.constant 0 : i32
    %c0_i32_1 = arith.constant 0 : i32
    return %c0_i32, %c0_i32_0 : i32, i32
  }
  func.func @transform_8(%arg0: i32, %arg1: i32) -> (i32, i32) {
    %c0_i32 = arith.constant 0 : i32
    %c0_i32_0 = arith.constant 0 : i32
    %c0_i32_1 = arith.constant 0 : i32
    return %c0_i32, %c0_i32_0 : i32, i32
  }
  func.func @transform_9(%arg0: i32, %arg1: i32) -> (i32, i32) {
    %c0_i32 = arith.constant 0 : i32
    %c0_i32_0 = arith.constant 0 : i32
    %c0_i32_1 = arith.constant 0 : i32
    return %c0_i32, %c0_i32_0 : i32, i32
  }
  func.func @transform_10(%arg0: i32, %arg1: i32) -> (i32, i32) {
    %c0_i32 = arith.constant 0 : i32
    %c0_i32_0 = arith.constant 0 : i32
    %c0_i32_1 = arith.constant 0 : i32
    return %c0_i32, %c0_i32_0 : i32, i32
  }
  func.func @transform_11(%arg0: i32, %arg1: i32) -> (i32, i32) {
    %c0_i32 = arith.constant 0 : i32
    %c0_i32_0 = arith.constant 0 : i32
    %c0_i32_1 = arith.constant 0 : i32
    return %c0_i32, %c0_i32_0 : i32, i32
  }
  func.func @transform_12(%arg0: i32, %arg1: i32) -> (i32, i32) {
    %c0_i32 = arith.constant 0 : i32
    %c0_i32_0 = arith.constant 0 : i32
    %c0_i32_1 = arith.constant 0 : i32
    return %c0_i32, %c0_i32_0 : i32, i32
  }
  func.func @transform_13(%arg0: i32, %arg1: i32) -> (i32, i32) {
    %c0_i32 = arith.constant 0 : i32
    %c0_i32_0 = arith.constant 0 : i32
    %c0_i32_1 = arith.constant 0 : i32
    return %c0_i32, %c0_i32_0 : i32, i32
  }
  func.func @transform_14(%arg0: i32, %arg1: i32) -> (i32, i32) {
    %c0_i32 = arith.constant 0 : i32
    %c0_i32_0 = arith.constant 0 : i32
    %c0_i32_1 = arith.constant 0 : i32
    return %c0_i32, %c0_i32_0 : i32, i32
  }
  func.func @transform_15(%arg0: i32, %arg1: i32) -> (i32, i32) {
    %c0_i32 = arith.constant 0 : i32
    %c0_i32_0 = arith.constant 0 : i32
    %c0_i32_1 = arith.constant 0 : i32
    return %c0_i32, %c0_i32_0 : i32, i32
  }
  func.func @transform_16(%arg0: i32, %arg1: i32) -> (i32, i32) {
    %c0_i32 = arith.constant 0 : i32
    %c0_i32_0 = arith.constant 0 : i32
    %c0_i32_1 = arith.constant 0 : i32
    return %c0_i32, %c0_i32_0 : i32, i32
  }
  func.func @transform_17(%arg0: i32, %arg1: i32) -> (i32, i32) {
    %c0_i32 = arith.constant 0 : i32
    %c0_i32_0 = arith.constant 0 : i32
    %c0_i32_1 = arith.constant 0 : i32
    return %c0_i32, %c0_i32_0 : i32, i32
  }
  func.func @transform_18(%arg0: i32, %arg1: i32) -> (i32, i32, i32) {
    %c0_i32 = arith.constant 0 : i32
    %c0_i32_0 = arith.constant 0 : i32
    return %arg0, %c0_i32, %arg1 : i32, i32, i32
  }
}

</mosaic_0001>

<bundles_post_ra>
// kernel: tpu_custom_call.1
= control target key start
LH: loop header
LB: loop body
LE: loop exit
PB: predicated region body
PF: predicated region fallthrough
CT: control target
= control target key end

     0   :  { %s2395_s0 = inlined_call_operand.vmem [shape: bf16[2,16,256], index: 0, kind: input, shape index: {}]   ;;  %s2396_s1 = inlined_call_operand.vmem [shape: f32[2,2,256], index: 1, kind: input, shape index: {}]   ;;  %s2397_s2 = inlined_call_operand.vmem [shape: bf16[16,2], index: 2, kind: input, shape index: {}]   ;;  %s2398_s3 = inlined_call_operand.vmem [shape: f32[16,1], index: 3, kind: input, shape index: {}]   ;;  %s2399_s4 = inlined_call_operand.vmem [shape: bf16[16,16], index: 4, kind: input, shape index: {}]   ;;  %s2400_s5 = inlined_call_operand.vmem [shape: f32[16,1], index: 5, kind: input, shape index: {}]   ;;  %s2401_s6 = inlined_call_operand.vmem [shape: bf16[32,16], index: 6, kind: input, shape index: {}]   ;;  %s2402_s7 = inlined_call_operand.vmem [shape: f32[32,1], index: 7, kind: input, shape index: {}]   ;;  %s2403_s8 = inlined_call_operand.vmem [shape: bf16[32,32], index: 8, kind: input, shape index: {}]   ;;  %s2404_s9 = inlined_call_operand.vmem [shape: f32[32,1], index: 9, kind: input, shape index: {}]   ;;  %s2405_s10 = inlined_call_operand.vmem [shape: bf16[32,32], index: 10, kind: input, shape index: {}]   ;;  %s2406_s11 = inlined_call_operand.vmem [shape: f32[32,1], index: 11, kind: input, shape index: {}]   ;;  %s2407_s12 = inlined_call_operand.vmem [shape: bf16[32,32], index: 12, kind: input, shape index: {}]   ;;  %s2408_s13 = inlined_call_operand.vmem [shape: f32[32,1], index: 13, kind: input, shape index: {}]   ;;  %s2409_s14 = inlined_call_operand.vmem [shape: bf16[32,32], index: 14, kind: input, shape index: {}]   ;;  %s2410_s15 = inlined_call_operand.vmem [shape: f32[32,1], index: 15, kind: input, shape index: {}]   ;;  %s2411_s16 = inlined_call_operand.vmem [shape: bf16[4,32], index: 16, kind: input, shape index: {}]   ;;  %s2412_s17 = inlined_call_operand.vmem [shape: f32[4,1], index: 17, kind: input, shape index: {}]   ;;  %s2413_s18 = inlined_call_operand.hbm [shape: f32[2,4,256], index: 18, kind: output, shape index: {}]  }
   0x1   :  { %2423 = sst [smem:[#allocation11_spill]] %s2395_s0 }
   0x2   :  { %2424 = sst [smem:[#allocation12_spill]] %s2396_s1 }
   0x3   :  { %2425 = sst [smem:[#allocation13_spill]] %s2397_s2 }
   0x4   :  { %2426 = sst [smem:[#allocation14_spill]] %s2398_s3 }
   0x5   :  { %2427 = sst [smem:[#allocation15_spill]] %s2399_s4 }
   0x6   :  { %2428 = sst [smem:[#allocation16_spill]] %s2400_s5 }
   0x7   :  { %2429 = sst [smem:[#allocation17_spill]] %s2407_s12 }
   0x8   :  { %2430 = sst [smem:[#allocation18_spill]] %s2409_s14 }
   0x9   :  { %2431 = sst [smem:[#allocation19_spill]] %s2411_s16 }
   0xa   :  { %2432 = sst [smem:[#allocation20_spill]] %s2413_s18 }
   0xb   :  { %23 = vsyncpa [#allocation4], 0 }
   0xc   :  { %25 = vsyncpa [#allocation4 + $0x1], 0  ;;  %s2106_s27 = smov 0   ;;  %s2108_s28 = smov 0  }
   0xd   :  { %s2110_s29 = smov 0   ;;  %s2112_s30 = smov 0  }
   0xe   :  { %s2114_s0 = smov 0   ;;  %s2116_s19 = smov 0  }
   0xf   :  { %s2118_s1 = smov 0   ;;  %s2120_s20 = smov 0  }
  0x10 LB: > { %2433 = sst [smem:[#allocation6_spill]] %s1976_s27  ;;  %s1640_s21 = sadd.s32 4294967295, %s2004_s20   ;;  %s2004_s20 = sphi %s2120_s20, %s31_s20   ;;  %s2000_s1 = sphi %s2118_s1, %s2462_s1   ;;  %s1996_s19 = sphi %s2116_s19, %s2461_s19   ;;  %s1992_s0 = sphi %s2114_s0, %s2460_s0   ;;  %s1988_s30 = sphi %s2112_s30, %s2459_s30   ;;  %s1984_s29 = sphi %s2110_s29, %s2458_s29   ;;  %s1980_s28 = sphi %s2108_s28, %s2457_s28   ;;  %s1976_s27 = sphi %s2106_s27, %s2456_s27  }
  0x11   : > { %s1641_s22 = sadd.s32 4294967294, %s2004_s20   ;;  %s40_s2 = sadd.s32 1, %s1996_s19 }
  0x12   : > { %p41_p0 = scmp.ge.s32.totalorder %s40_s2, 2  ;;  %s43_s23 = sadd.s32 1, %s2000_s1 }
  0x13   : > { %p59_p1 = scmp.ne.s32.totalorder %s1984_s29, %s1980_s28  ;;  %p60_p2 = scmp.eq.s32.totalorder %s2004_s20, 0 }
  0x14   : > { %s2464_s2 = smov (%p41_p0, %s40_s2), 0  ;;  %s2466_s23 = smov (!%p41_p0, %s43_s23), %s2000_s1 }
  0x15   : > { %2434 = sst [smem:[#allocation7_spill]] %s2464_s2  ;;  %s48_s24 = ssub.s32 %s1996_s19, %s2464_s2 }
  0x16   : > { %p2158_p3 = por %p60_p2, %p59_p1  ;;  %p45_p4 = scmp.ge.s32.totalorder %s2466_s23, 2 }
  0x17   : > { %p455_p5 = scmp.eq.s32.totalorder %s1640_s21, 3  ;;  %p460_p6 = scmp.ne.s32.totalorder %s1980_s28, %s1976_s27 }
  0x18   : > { %p461_p7 = scmp.eq.s32.totalorder %s1641_s22, 3  ;;  %s2468_s23 = smov (%p45_p4, %s2466_s23), 0 }
  0x19   : > { %2436 = sst [smem:[#allocation8_spill]] %s2468_s23  ;;  %p2166_p8 = por %p455_p5, %p59_p1 }
  0x1a   : > { %p2170_p9 = por %p461_p7, %p460_p6  ;;  %s47_s2 = ssub.s32 %s2000_s1, %s2468_s23 }
  0x1b   : > { %s2437_s26 = scalar_select %p2166_p8, 1, 0 }
  0x1c   : > { %s2439_s18 = scalar_select %p2170_p9, 1, 0 }
  0x1d   : > { %2438 = sst [smem:[#allocation9_spill]] %s2437_s26  ;;  %s49_s16 = sor.u32 %s48_s24, %s47_s2 }
  0x1e   : > { %2440 = sst [smem:[#allocation10_spill]] %s2439_s18  ;;  %s52_s14 = sadd.s32 1, %s1984_s29 }
  0x1f   : > { %p50_p10 = scmp.eq.s32.totalorder %s49_s16, 0  ;;  %p1643_p11 = scmp.ge.s32.totalorder %s2004_s20, 4 }
  0x21   : > { %s2178_s12 = scalar_select %p50_p10, %s1984_s29, %s52_s14  }
  0x22   : > { %525 = sbr.rel (%p1643_p11) target bundleno = 52 (0x34), region = 80 }
  0x29   : > { %528 = sbr.rel (!%p2158_p3) target bundleno = 52 (0x34), region = 84  ;;  %s530_s21 = sand.u32 (%p2158_p3), 1, %s1984_s29  }
  0x2a   : > { %s1645_s22 = sshll.u32 (%p2158_p3), %s2000_s1, 2  ;;  %s1644_s27 = sshll.u32 (%p2158_p3), %s530_s21, 3 }
  0x2b   : > { %s534_s26 = sadd.s32 (%p2158_p3), %s1996_s19, %s1645_s22  ;;  %s2441_s24 = sld [smem:[#allocation11_spill]] (%p2158_p3) }
  0x2c   : > { %s1646_s18 = sshll.u32 (%p2158_p3), %s534_s26, 2  ;;  %s532_s14 = scalar_lea.vmem (%p2158_p3), [#allocation2], %s1644_s27 }
  0x31   : > { %s536_s16 = scalar_lea.vmem %s2441_s24, %s1646_s18 }
  0x32   : > { %v552_v0 = vld [vmem:[%s536_s16] sm:$0xf]  ;;  %v554_v1 = vld [vmem:[%s536_s16 + $0x8] sm:$0xf] }
  0x33   : > { %553 = vst [vmem:[%s532_s14] sm:$0xf] %v552_v0  ;;  %555 = vst [vmem:[%s532_s14 + $0x4] sm:$0xf] %v554_v1 }
  0x34 PF: > { %p1647_p12 = scmp.ge.s32.totalorder %s2004_s20, 1  ;;  %p592_p13 = scmp.lt.s32.totalorder %s2004_s20, 5 }
  0x36   : > { %p593_p0 = pnand %p1647_p12, %p592_p13 }
  0x37   : > { %s2442_s3 = sld [smem:[#allocation14_spill]] (!%p593_p0)  ;;  %s2443_s18 = sld [smem:[#allocation13_spill]] (!%p593_p0)  ;;  %v2006_v4 = vmov (!%p593_p0), 0   ;;  %v2007_v10 = vmov (!%p593_p0), 1   ;;  %v814_v11 = vld [vmem:[%s2402_s7] sm:$0xff] (!%p593_p0)  ;;  %v815_v12 = vld [vmem:[%s2402_s7 + $0x8] sm:$0xff] (!%p593_p0)  ;;  %v684_v34 = vlaneseq (!%p593_p0) }
  0x38   : > { %596 = sbr.rel (%p593_p0) target bundleno = 1989 (0x7c5), region = 129  ;;  %1851 = vset.pattern.permute.xlu1 (!%p593_p0), %v2006_v4  ;;  %1839 = vset.pattern.permute.xlu0 (!%p593_p0), %v2006_v4  ;;  %s2444_s5 = sld [smem:[#allocation16_spill]] (!%p593_p0)  ;;  %v817_v13 = vld [vmem:[%s2402_s7 + $0x18] sm:$0xff] (!%p593_p0)  ;;  %v946_v14 = vld [vmem:[%s2404_s9 + $0x8] sm:$0xff] (!%p593_p0)  ;;  %v2008_v20 = vmov (!%p593_p0), 0.0   ;;  %vm2009_vm0 = vmmov (!%p593_p0), 0  }
  0x39   : > { %v948_v15 = vld [vmem:[%s2404_s9 + $0x18] sm:$0xff] (!%p593_p0)  ;;  %v1078_v16 = vld [vmem:[%s2406_s11 + $0x8] sm:$0xff] (!%p593_p0)  ;;  %1712 = vmatprep.subr.bf16.mxu0 (!%p593_p0), %v2008_v20  ;;  %1714 = vmatprep.mubr.msk.bf16.mxu0 (!%p593_p0), %vm2009_vm0, %v2008_v20  ;;  %v816_v24 = vld [vmem:[%s2402_s7 + $0x10] sm:$0xff] (!%p593_p0)  ;;  %p660_p1 = scmp.lt.s32.totalorder (!%p593_p0), %s1992_s0, 1  ;;  %p662_p2 = scmp.lt.s32.totalorder (!%p593_p0), %s1988_s30, 1  ;;  %v685_v35 = vshrl.u32 (!%p593_p0), %v684_v34, 7 }
  0x3a   : > { %v1080_v17 = vld [vmem:[%s2406_s11 + $0x18] sm:$0xff] (!%p593_p0)  ;;  %v1209_v18 = vld [vmem:[%s2408_s13 + $0x8] sm:$0xff] (!%p593_p0)  ;;  %v945_v25 = vld [vmem:[%s2404_s9] sm:$0xff] (!%p593_p0)  ;;  %s2446_s4 = sld [smem:[#allocation15_spill]] (!%p593_p0)  ;;  %vm758_vm1 = vcmask (!%p593_p0), 130048   ;;  %vm979_vm2 = vcmask (!%p593_p0), 261120  }
  0x3b   : > { %v1211_v19 = vld [vmem:[%s2408_s13 + $0x18] sm:$0xff] (!%p593_p0)  ;;  %v1340_v21 = vld [vmem:[%s2410_s15 + $0x8] sm:$0xff] (!%p593_p0)  ;;  %v947_v26 = vld [vmem:[%s2404_s9 + $0x10] sm:$0xff] (!%p593_p0)  ;;  %v686_v36 = vsub.s32 (!%p593_p0), 0, %v685_v35  ;;  %v700_v38 = vsub.s32 (!%p593_p0), 1, %v685_v35  ;;  %s2448_s22 = sld [smem:[#allocation18_spill]] (!%p593_p0) }
  0x3c   : > { %v1342_v22 = vld [vmem:[%s2410_s15 + $0x18] sm:$0xff] (!%p593_p0)  ;;  %v1077_v27 = vld [vmem:[%s2406_s11] sm:$0xff] (!%p593_p0)  ;;  %v1079_v28 = vld [vmem:[%s2406_s11 + $0x10] sm:$0xff] (!%p593_p0) }
  0x3d   : > { %v706_v2 = vld [vmem:[%s2442_s3] sm:$0xff] (!%p593_p0)  ;;  %v707_v8 = vld [vmem:[%s2442_s3 + $0x8] sm:$0xff] (!%p593_p0)  ;;  %v1210_v30 = vld [vmem:[%s2408_s13 + $0x10] sm:$0xff] (!%p593_p0)  ;;  %s2445_s3 = sld [smem:[#allocation12_spill]] (!%p593_p0) }
  0x3e   : > { %v1681_v3 = vld [vmem:[%s2443_s18] sm:$0xff] (!%p593_p0)   ;;  %710 = vperm.xlu1 (!%p593_p0), %1851, %v706_v2   ;;  %v742_v23 = vld [vmem:[%s2444_s5 + $0x8] sm:$0xff] (!%p593_p0)  ;;  %v1341_v32 = vld [vmem:[%s2410_s15 + $0x10] sm:$0xff] (!%p593_p0) }
  0x3f   : > { %v1682_v5 = vunpack.c.l.bf16 %v1681_v3  ;;  %v1683_v6 = vunpack.c.h.bf16 %v1681_v3  ;;  %v741_v9 = vld [vmem:[%s2444_s5] sm:$0xff]  ;;  %s661_s16 = scalar_select %p660_p1, %s1992_s0, 1 }
  0x40   : > { %v1208_v29 = vld [vmem:[%s2408_s13] sm:$0xff]  ;;  %s663_s14 = scalar_select %p662_p2, %s1988_s30, 1 }
  0x41   : > { %v1840_v7 = vpack.i.bf16 %v1683_v6, %v1682_v5  ;;  %v1339_v31 = vld [vmem:[%s2410_s15] sm:$0xff]  ;;  %s1650_s25 = sshll.u32 %s661_s16, 1  ;;  %s2288_s16 = sand.u32 1, %s1980_s28  }
  0x42   : > { %715 = vperm.xlu1 %1851, %v707_v8   ;;  %v1467_v33 = vld [vmem:[%s2412_s17] sm:$0xf]  ;;  %s665_s21 = sadd.s32 %s1650_s25, %s663_s14  ;;  %s1648_s14 = sshll.u32 %s2288_s16, 3 }
  0x43   : > { %1841 = vperm.xlu0 %1839, %v1840_v7   ;;  %s1651_s26 = sshll.u32 %s665_s21, 1  ;;  %s601_s25 = scalar_lea.vmem [#allocation2], %s1648_s14 }
  0x44   : > { %s667_s27 = scalar_lea.vmem %s2445_s3, %s1651_s26  ;;  %s2447_s26 = sld [smem:[#allocation17_spill]] }
  0x45   : > { %v669_v39 = vld [vmem:[%s667_s27] sm:$0x3]  ;;  %s2449_s21 = sld [smem:[#allocation19_spill]]  ;;  %s1649_s23 = sshll.u32 %s2288_s16, 2 }
  0x46   : > { %745 = vperm.xlu1 %1851, %v741_v9   ;;  %v687_v42 = vrot.slane %v669_v39, %v686_v36  ;;  %v701_v43 = vrot.slane %v669_v39, %v700_v38  ;;  %s1676_s27 = sshll.u32 %s1992_s0, 1  ;;  %s659_s24 = scalar_lea.vmem [#allocation3], %s1649_s23 }
  0x47   : > { %1845 = vset.pattern.permute.xlu0 %v2007_v10  ;;  %s1538_s3 = sadd.s32 %s1988_s30, %s1676_s27  ;;  %s1542_s14 = sshll.u32 %s659_s24, 4  ;;  %s2343_s14 = int_to_ptr.vmem [resolvable:$true] %s1542_s14 }
  0x48   : > { %1847 = vperm.xlu0 %1845, %v1840_v7   ;;  %s1677_s2 = sshll.u32 %s1538_s3, 6  ;;  %s1527_s0 = scalar_lea.sflag [#allocation4], %s2288_s16 }
  0x49   : > { %s1910_s30 = scalar_lea.vmem %s2343_s14, 64  ;;  %s2010_s23 = smov [#allocation3]  }
  0x4a   : > { %820 = vperm.xlu1 %1851, %v814_v11   ;;  %p1911_p3 = scmp.ne.s32.totalorder %s2343_s14, %s1910_s30  ;;  %s1914_s27 = sshll.u32 %s2010_s23, 4  ;;  %s1915_s27 = int_to_ptr.vmem [resolvable:$false] %s1914_s27 }
  0x4b   : > { %s1916_s3 = scalar_lea.vmem %s1915_s27, 128  ;;  %p1917_p6 = scmp.lt.s32.totalorder %s2343_s14, %s1915_s27 }
  0x4c   : > { %1852 = vset.pattern.permute.xlu0 %v2006_v4  ;;  %p1912_p4 = pnand %p1911_p3, %p2166_p8  ;;  %p1918_p7 = scmp.lt.s32.totalorder %s1916_s3, %s1910_s30 }
  0x4d   : > { %750 = vperm.xlu0 %1852, %v742_v23  }
  0x4e   : > { %825 = vperm.xlu1 %1851, %v815_v12   ;;  %v1853_v12 = vld [vmem:[%s2446_s4] sm:$0xff]   ;;  %s2451_s4 = sld [smem:[#allocation20_spill]]  ;;  %p1913_p5 = pneg %p1912_p4 }
  0x4f   : > { %p1919_p10 = por %p1918_p7, %p1917_p6 }
  0x51   : > { %830 = vperm.xlu0 %1852, %v816_v24   ;;  %p1920_p11 = pnand %p1919_p10, %p1913_p5 }
  0x52   : > { %835 = vperm.xlu1 %1851, %v817_v13   ;;  %v1854_v13 = vld [vmem:[%s2401_s6] sm:$0xff]  }
  0x53   : > { %1720 = vmatprep.mubr.msk.bf16.mxu1 %vm758_vm1, %v1854_v13 }
  0x54   : > { %s2341_s5 = scalar_lea.hbm %s2451_s4, %s1677_s2 }
  0x55   : > { %951 = vperm.xlu0 %1852, %v945_v25  }
  0x56   : > { %956 = vperm.xlu1 %1851, %v946_v14   ;;  %v1685_v14 = vld [vmem:[%s601_s25] sm:$0xff]  }
  0x59   : > { %961 = vperm.xlu0 %1852, %v947_v26  }
  0x5a   : > { %966 = vperm.xlu1 %1851, %v948_v15  }
  0x5d   : > { %1083 = vperm.xlu0 %1852, %v1077_v27  }
  0x5e   : > { %1088 = vperm.xlu1 %1851, %v1078_v16  }
  0x61   : > { %1093 = vperm.xlu0 %1852, %v1079_v28  }
  0x62   : > { %1098 = vperm.xlu1 %1851, %v1080_v17  }
  0x65   : > { %1214 = vperm.xlu0 %1852, %v1208_v29   ;;  %v1855_v29 = vld [vmem:[%s2401_s6 + $0x8] sm:$0xff]  }
  0x66   : > { %1219 = vperm.xlu1 %1851, %v1209_v18   ;;  %v1686_v18 = vunpack.c.l.bf16 %v1685_v14 }
  0x69   : > { %1224 = vperm.xlu0 %1852, %v1210_v30   ;;  %v1856_v30 = vld [vmem:[%s2403_s8] sm:$0xff]  }
  0x6a   : > { %1229 = vperm.xlu1 %1851, %v1211_v19  }
  0x6d   : > { %1345 = vperm.xlu0 %1852, %v1339_v31  }
  0x6e   : > { %1350 = vperm.xlu1 %1851, %v1340_v21   ;;  %v1687_v21 = vunpack.c.h.bf16 %v1685_v14 }
  0x71   : > { %1355 = vperm.xlu0 %1852, %v1341_v32  }
  0x72   : > { %1360 = vperm.xlu1 %1851, %v1342_v22  }
  0x75   : > { %1470 = vperm.xlu0 %1852, %v1467_v33  }
  0xbd   : > { %v711_v44 = vpop.permute.xlu1 %710 }
  0xc1   : > { %v716_v54 = vpop.permute.xlu1 %715 }
  0xc2   : > { %v1842_v37 = vpop.permute.xlu0 %1841 }
  0xc3   : > { %v1844_v40 = vunpack.i.h.bf16 %v1842_v37  ;;  %v1843_v41 = vunpack.i.l.bf16 %v1842_v37 }
  0xc5   : > { %v688_v48 = vmul.f32 %v1843_v41, %v687_v42  ;;  %v689_v49 = vmul.f32 %v1844_v40, %v687_v42  ;;  %v746_v15 = vpop.permute.xlu1 %745 }
  0xc7   : > { %v1848_v45 = vpop.permute.xlu0 %1847 }
  0xc8   : > { %v1850_v46 = vunpack.i.h.bf16 %v1848_v45  ;;  %v1849_v47 = vunpack.i.l.bf16 %v1848_v45 }
  0xc9   : > { %v821_v31 = vpop.permute.xlu1 %820 }
  0xca   : > { %v702_v50 = vmul.f32 %v1849_v47, %v701_v43  ;;  %v703_v51 = vmul.f32 %v1850_v46, %v701_v43 }
  0xcc   : > { %v704_v52 = vadd.f32 %v702_v50, %v688_v48  ;;  %v705_v53 = vadd.f32 %v703_v51, %v689_v49  ;;  %v751_v22 = vpop.permute.xlu0 %750 }
  0xcd   : > { %v826_v32 = vpop.permute.xlu1 %825 }
  0xce   : > { %v718_v55 = vadd.f32 %v711_v44, %v704_v52  ;;  %v719_v56 = vadd.f32 %v716_v54, %v705_v53 }
  0xd0   : > { %v720_v57 = vmul.f32 %v718_v55, %v718_v55  ;;  %v721_v58 = vmul.f32 %v719_v56, %v719_v56  ;;  %v831_v33 = vpop.permute.xlu0 %830 }
  0xd1   : > { %v836_v37 = vpop.permute.xlu1 %835 }
  0xd2   : > { %v722_v59 = vmul.f32 %v720_v57, %v718_v55  ;;  %v723_v60 = vmul.f32 %v721_v58, %v719_v56 }
  0xd4   : > { %v724_v61 = vmul.f32 0.044715, %v722_v59  ;;  %v725_v62 = vmul.f32 0.044715, %v723_v60 }
  0xd6   : > { %v726_v63 = vadd.f32 %v724_v61, %v718_v55  ;;  %v727_v0 = vadd.f32 %v725_v62, %v719_v56 }
  0xd8   : > { %v728_v1 = vmul.f32 0.7978846, %v726_v63  ;;  %v729_v2 = vmul.f32 0.7978846, %v727_v0 }
  0xda   : > { %1864 = vtanh.f32 %v728_v1 }
  0xdb   : > { %1866 = vtanh.f32 %v729_v2 }
  0xe4   : > { %v1865_v3 = vpop.eup %1864 }
  0xe5   : > { %v1867_v4 = vpop.eup %1866  ;;  %v732_v5 = vadd.f32 1.0, %v1865_v3 }
  0xe6   : > { %v733_v6 = vadd.f32 1.0, %v1867_v4 }
  0xe7   : > { %v734_v7 = vmul.f32 0.5, %v732_v5 }
  0xe8   : > { %v735_v8 = vmul.f32 0.5, %v733_v6 }
  0xe9   : > { %v736_v9 = vmul.f32 %v734_v7, %v718_v55 }
  0xea   : > { %v737_v10 = vmul.f32 %v735_v8, %v719_v56 }
  0xec   : > { %v740_v11 = vpack.c.bf16 %v737_v10, %v736_v9 }
  0xee   : > { %1713 = vmatpush3.bf16.msra.mxu0 %v740_v11 }
  0xf1   : > { %1715 = vmatmul.mubr.msk.bf16.vlgmr.msra.gmra.mrb[0].mxu0 %vm758_vm1, %v1853_v12 }
  0xf2   : > { %1728 = vmatprep.mubr.msk.bf16.mxu0 %vm979_vm2, %v1856_v30 }
 0x1c4   : > { %v796_v16 = vpop.f32.mrb[0].mxu0 }
 0x1c5   : > { %v797_v17 = vadd.f32 %v796_v16, %v746_v15  ;;  %v1716_v19 = vpop.f32.mrb[1].mxu0 }
 0x1c6   : > { %v799_v23 = vpop.f32.mrb[2].mxu0  ;;  %v952_v19 = vpop.permute.xlu0 %951 }
 0x1c7   : > { %v800_v24 = vadd.f32 %v799_v23, %v751_v22  ;;  %v1717_v25 = vpop.f32.mrb[3].mxu0  ;;  %v807_v26 = vadd.f32 %v1686_v18, %v797_v17  ;;  %v1857_v17 = vld [vmem:[%s2403_s8 + $0x8] sm:$0xff]   ;;  %v1858_v18 = vld [vmem:[%s2405_s10] sm:$0xff]  }
 0x1c9   : > { %v808_v27 = vadd.f32 %v1687_v21, %v800_v24  ;;  %v957_v21 = vpop.permute.xlu1 %956 }
 0x1ca   : > { %v962_v22 = vpop.permute.xlu0 %961 }
 0x1cb   : > { %v813_v28 = vpack.c.bf16 %v808_v27, %v807_v26 }
 0x1cd   : > { %1718 = vmatprep.subr.bf16.mxu1 %v813_v28  ;;  %v967_v26 = vpop.permute.xlu1 %966 }
 0x1ce   : > { %1719 = vmatpush3.bf16.msra.mxu1 %v813_v28 }
 0x1d1   : > { %1721 = vmatmul.mubr.msk.bf16.vlgmr.msra.gmra.mrb[0].mxu1 %vm758_vm1, %v1855_v29 }
 0x1d2   : > { %1736 = vmatprep.mubr.msk.bf16.mxu1 %vm979_vm2, %v1858_v18 }
 0x2a4   : > { %v1722_v34 = vpop.f32.mrb[0].mxu1 }
 0x2a5   : > { %v897_v35 = vadd.f32 %v1722_v34, %v831_v33  ;;  %v888_v36 = vpop.f32.mrb[1].mxu1 }
 0x2a6   : > { %v889_v38 = vadd.f32 %v888_v36, %v821_v31  ;;  %v1723_v39 = vpop.f32.mrb[2].mxu1 }
 0x2a7   : > { %v905_v40 = vmul.f32 %v897_v35, %v897_v35  ;;  %v900_v41 = vadd.f32 %v1723_v39, %v836_v37  ;;  %v891_v42 = vpop.f32.mrb[3].mxu1 }
 0x2a8   : > { %v903_v43 = vmul.f32 %v889_v38, %v889_v38  ;;  %v892_v44 = vadd.f32 %v891_v42, %v826_v32 }
 0x2a9   : > { %v909_v45 = vmul.f32 %v905_v40, %v897_v35  ;;  %v906_v46 = vmul.f32 %v900_v41, %v900_v41 }
 0x2aa   : > { %v907_v47 = vmul.f32 %v903_v43, %v889_v38  ;;  %v904_v48 = vmul.f32 %v892_v44, %v892_v44 }
 0x2ab   : > { %v913_v49 = vmul.f32 0.044715, %v909_v45  ;;  %v910_v50 = vmul.f32 %v906_v46, %v900_v41 }
 0x2ac   : > { %v911_v51 = vmul.f32 0.044715, %v907_v47  ;;  %v908_v52 = vmul.f32 %v904_v48, %v892_v44 }
 0x2ad   : > { %v917_v53 = vadd.f32 %v913_v49, %v897_v35  ;;  %v914_v54 = vmul.f32 0.044715, %v910_v50 }
 0x2ae   : > { %v915_v55 = vadd.f32 %v911_v51, %v889_v38  ;;  %v912_v56 = vmul.f32 0.044715, %v908_v52 }
 0x2af   : > { %v921_v57 = vmul.f32 0.7978846, %v917_v53  ;;  %v918_v58 = vadd.f32 %v914_v54, %v900_v41 }
 0x2b0   : > { %v919_v59 = vmul.f32 0.7978846, %v915_v55  ;;  %v916_v60 = vadd.f32 %v912_v56, %v892_v44 }
 0x2b1   : > { %1868 = vtanh.f32 %v921_v57  ;;  %v922_v61 = vmul.f32 0.7978846, %v918_v58 }
 0x2b2   : > { %1870 = vtanh.f32 %v919_v59  ;;  %v920_v62 = vmul.f32 0.7978846, %v916_v60 }
 0x2b3   : > { %1872 = vtanh.f32 %v922_v61 }
 0x2b4   : > { %1874 = vtanh.f32 %v920_v62 }
 0x2bb   : > { %v1869_v63 = vpop.eup %1868 }
 0x2bc   : > { %v1871_v0 = vpop.eup %1870  ;;  %v929_v1 = vadd.f32 1.0, %v1869_v63 }
 0x2bd   : > { %v1873_v2 = vpop.eup %1872  ;;  %v927_v3 = vadd.f32 1.0, %v1871_v0 }
 0x2be   : > { %v1875_v4 = vpop.eup %1874  ;;  %v930_v5 = vadd.f32 1.0, %v1873_v2  ;;  %v933_v6 = vmul.f32 0.5, %v929_v1 }
 0x2bf   : > { %v928_v7 = vadd.f32 1.0, %v1875_v4  ;;  %v931_v8 = vmul.f32 0.5, %v927_v3 }
 0x2c0   : > { %v934_v9 = vmul.f32 0.5, %v930_v5  ;;  %v937_v11 = vmul.f32 %v933_v6, %v897_v35  ;;  %v1859_v6 = vld [vmem:[%s2405_s10 + $0x8] sm:$0xff]  }
 0x2c1   : > { %v932_v10 = vmul.f32 0.5, %v928_v7  ;;  %v935_v13 = vmul.f32 %v931_v8, %v889_v38  ;;  %v1860_v7 = vld [vmem:[%s2447_s26] sm:$0xff]   ;;  %v1084_v8 = vpop.permute.xlu0 %1083 }
 0x2c2   : > { %v938_v12 = vmul.f32 %v934_v9, %v900_v41  ;;  %v1089_v9 = vpop.permute.xlu1 %1088 }
 0x2c3   : > { %v936_v14 = vmul.f32 %v932_v10, %v892_v44 }
 0x2c4   : > { %v944_v15 = vpack.c.bf16 %v938_v12, %v937_v11 }
 0x2c5   : > { %v943_v16 = vpack.c.bf16 %v936_v14, %v935_v13  ;;  %v1094_v10 = vpop.permute.xlu0 %1093 }
 0x2c6   : > { %v1099_v14 = vpop.permute.xlu1 %1098 }
 0x2c7   : > { %1724 = vmatprep.subr.bf16.mxu0 %v943_v16 }
 0x2c8   : > { %1725 = vmatpush3.bf16.msra.mxu0 %v943_v16 }
 0x2c9   : > { %1726 = vmatprep.subr.bf16.mxu0 %v944_v15 }
 0x2cc   : > { %1727 = vmatpush3.bf16.msra.mxu0 %v944_v15 }
 0x2cf   : > { %1729 = vmatmul.mubr.msk.bf16.vlgmr.msra.gmra.mrb[4].mxu0 %vm979_vm2, %v1857_v17 }
 0x2d0   : > { %1744 = vmatprep.mubr.msk.bf16.mxu0 %vm979_vm2, %v1860_v7 }
 0x3a2   : > { %v1730_v23 = vpop.f32.mrb[4].mxu0 }
 0x3a3   : > { %v1029_v24 = vadd.f32 %v1730_v23, %v962_v22  ;;  %v1020_v25 = vpop.f32.mrb[5].mxu0 }
 0x3a4   : > { %v1021_v27 = vadd.f32 %v1020_v25, %v952_v19  ;;  %v1731_v28 = vpop.f32.mrb[6].mxu0 }
 0x3a5   : > { %v1037_v29 = vmul.f32 %v1029_v24, %v1029_v24  ;;  %v1032_v30 = vadd.f32 %v1731_v28, %v967_v26  ;;  %v1023_v31 = vpop.f32.mrb[7].mxu0 }
 0x3a6   : > { %v1035_v32 = vmul.f32 %v1021_v27, %v1021_v27  ;;  %v1024_v33 = vadd.f32 %v1023_v31, %v957_v21 }
 0x3a7   : > { %v1041_v34 = vmul.f32 %v1037_v29, %v1029_v24  ;;  %v1038_v35 = vmul.f32 %v1032_v30, %v1032_v30 }
 0x3a8   : > { %v1039_v36 = vmul.f32 %v1035_v32, %v1021_v27  ;;  %v1036_v37 = vmul.f32 %v1024_v33, %v1024_v33 }
 0x3a9   : > { %v1045_v38 = vmul.f32 0.044715, %v1041_v34  ;;  %v1042_v39 = vmul.f32 %v1038_v35, %v1032_v30 }
 0x3aa   : > { %v1043_v40 = vmul.f32 0.044715, %v1039_v36  ;;  %v1040_v41 = vmul.f32 %v1036_v37, %v1024_v33 }
 0x3ab   : > { %v1049_v42 = vadd.f32 %v1045_v38, %v1029_v24  ;;  %v1046_v43 = vmul.f32 0.044715, %v1042_v39 }
 0x3ac   : > { %v1047_v44 = vadd.f32 %v1043_v40, %v1021_v27  ;;  %v1044_v45 = vmul.f32 0.044715, %v1040_v41 }
 0x3ad   : > { %v1053_v46 = vmul.f32 0.7978846, %v1049_v42  ;;  %v1050_v47 = vadd.f32 %v1046_v43, %v1032_v30 }
 0x3ae   : > { %v1051_v48 = vmul.f32 0.7978846, %v1047_v44  ;;  %v1048_v49 = vadd.f32 %v1044_v45, %v1024_v33 }
 0x3af   : > { %1876 = vtanh.f32 %v1053_v46  ;;  %v1054_v50 = vmul.f32 0.7978846, %v1050_v47 }
 0x3b0   : > { %1878 = vtanh.f32 %v1051_v48  ;;  %v1052_v51 = vmul.f32 0.7978846, %v1048_v49 }
 0x3b1   : > { %1880 = vtanh.f32 %v1054_v50 }
 0x3b2   : > { %1882 = vtanh.f32 %v1052_v51 }
 0x3b9   : > { %v1877_v52 = vpop.eup %1876 }
 0x3ba   : > { %v1879_v53 = vpop.eup %1878  ;;  %v1061_v54 = vadd.f32 1.0, %v1877_v52 }
 0x3bb   : > { %v1881_v55 = vpop.eup %1880  ;;  %v1059_v56 = vadd.f32 1.0, %v1879_v53 }
 0x3bc   : > { %v1883_v57 = vpop.eup %1882  ;;  %v1062_v58 = vadd.f32 1.0, %v1881_v55  ;;  %v1065_v59 = vmul.f32 0.5, %v1061_v54 }
 0x3bd   : > { %v1060_v60 = vadd.f32 1.0, %v1883_v57  ;;  %v1063_v61 = vmul.f32 0.5, %v1059_v56 }
 0x3be   : > { %v1066_v62 = vmul.f32 0.5, %v1062_v58  ;;  %v1069_v0 = vmul.f32 %v1065_v59, %v1029_v24  ;;  %v1861_v59 = vld [vmem:[%s2447_s26 + $0x8] sm:$0xff]  }
 0x3bf   : > { %v1064_v63 = vmul.f32 0.5, %v1060_v60  ;;  %v1067_v2 = vmul.f32 %v1063_v61, %v1021_v27  ;;  %v1862_v60 = vld [vmem:[%s2448_s22] sm:$0xff]   ;;  %v1215_v61 = vpop.permute.xlu0 %1214 }
 0x3c0   : > { %v1070_v1 = vmul.f32 %v1066_v62, %v1032_v30  ;;  %v1220_v62 = vpop.permute.xlu1 %1219 }
 0x3c1   : > { %v1068_v3 = vmul.f32 %v1064_v63, %v1024_v33 }
 0x3c2   : > { %v1076_v4 = vpack.c.bf16 %v1070_v1, %v1069_v0 }
 0x3c3   : > { %v1075_v5 = vpack.c.bf16 %v1068_v3, %v1067_v2  ;;  %v1225_v63 = vpop.permute.xlu0 %1224 }
 0x3c4   : > { %v1230_v3 = vpop.permute.xlu1 %1229 }
 0x3c5   : > { %1732 = vmatprep.subr.bf16.mxu1 %v1075_v5 }
 0x3c6   : > { %1733 = vmatpush3.bf16.msra.mxu1 %v1075_v5 }
 0x3c7   : > { %1734 = vmatprep.subr.bf16.mxu1 %v1076_v4 }
 0x3ca   : > { %1735 = vmatpush3.bf16.msra.mxu1 %v1076_v4 }
 0x3cd   : > { %1737 = vmatmul.mubr.msk.bf16.vlgmr.msra.gmra.mrb[4].mxu1 %vm979_vm2, %v1859_v6 }
 0x3ce   : > { %1752 = vmatprep.mubr.msk.bf16.mxu1 %vm979_vm2, %v1862_v60 }
 0x4a0   : > { %v1738_v11 = vpop.f32.mrb[4].mxu1 }
 0x4a1   : > { %v1160_v12 = vadd.f32 %v1738_v11, %v1094_v10  ;;  %v1151_v13 = vpop.f32.mrb[5].mxu1 }
 0x4a2   : > { %v1152_v15 = vadd.f32 %v1151_v13, %v1084_v8  ;;  %v1739_v16 = vpop.f32.mrb[6].mxu1 }
 0x4a3   : > { %v1168_v17 = vmul.f32 %v1160_v12, %v1160_v12  ;;  %v1163_v18 = vadd.f32 %v1739_v16, %v1099_v14  ;;  %v1154_v19 = vpop.f32.mrb[7].mxu1 }
 0x4a4   : > { %v1166_v21 = vmul.f32 %v1152_v15, %v1152_v15  ;;  %v1155_v22 = vadd.f32 %v1154_v19, %v1089_v9 }
 0x4a5   : > { %v1172_v23 = vmul.f32 %v1168_v17, %v1160_v12  ;;  %v1169_v24 = vmul.f32 %v1163_v18, %v1163_v18 }
 0x4a6   : > { %v1170_v25 = vmul.f32 %v1166_v21, %v1152_v15  ;;  %v1167_v26 = vmul.f32 %v1155_v22, %v1155_v22 }
 0x4a7   : > { %v1176_v27 = vmul.f32 0.044715, %v1172_v23  ;;  %v1173_v28 = vmul.f32 %v1169_v24, %v1163_v18 }
 0x4a8   : > { %v1174_v29 = vmul.f32 0.044715, %v1170_v25  ;;  %v1171_v30 = vmul.f32 %v1167_v26, %v1155_v22 }
 0x4a9   : > { %v1180_v31 = vadd.f32 %v1176_v27, %v1160_v12  ;;  %v1177_v32 = vmul.f32 0.044715, %v1173_v28 }
 0x4aa   : > { %v1178_v33 = vadd.f32 %v1174_v29, %v1152_v15  ;;  %v1175_v34 = vmul.f32 0.044715, %v1171_v30 }
 0x4ab   : > { %v1184_v35 = vmul.f32 0.7978846, %v1180_v31  ;;  %v1181_v36 = vadd.f32 %v1177_v32, %v1163_v18 }
 0x4ac   : > { %v1182_v37 = vmul.f32 0.7978846, %v1178_v33  ;;  %v1179_v38 = vadd.f32 %v1175_v34, %v1155_v22 }
 0x4ad   : > { %1884 = vtanh.f32 %v1184_v35  ;;  %v1185_v39 = vmul.f32 0.7978846, %v1181_v36 }
 0x4ae   : > { %1886 = vtanh.f32 %v1182_v37  ;;  %v1183_v40 = vmul.f32 0.7978846, %v1179_v38 }
 0x4af   : > { %1888 = vtanh.f32 %v1185_v39 }
 0x4b0   : > { %1890 = vtanh.f32 %v1183_v40 }
 0x4b7   : > { %v1885_v41 = vpop.eup %1884 }
 0x4b8   : > { %v1887_v42 = vpop.eup %1886  ;;  %v1192_v43 = vadd.f32 1.0, %v1885_v41 }
 0x4b9   : > { %v1889_v44 = vpop.eup %1888  ;;  %v1190_v45 = vadd.f32 1.0, %v1887_v42 }
 0x4ba   : > { %v1891_v46 = vpop.eup %1890  ;;  %v1193_v47 = vadd.f32 1.0, %v1889_v44  ;;  %v1196_v48 = vmul.f32 0.5, %v1192_v43 }
 0x4bb   : > { %v1191_v49 = vadd.f32 1.0, %v1891_v46  ;;  %v1194_v50 = vmul.f32 0.5, %v1190_v45 }
 0x4bc   : > { %v1197_v51 = vmul.f32 0.5, %v1193_v47  ;;  %v1200_v53 = vmul.f32 %v1196_v48, %v1160_v12  ;;  %v1863_v48 = vld [vmem:[%s2448_s22 + $0x8] sm:$0xff]  }
 0x4bd   : > { %v1195_v52 = vmul.f32 0.5, %v1191_v49  ;;  %v1198_v55 = vmul.f32 %v1194_v50, %v1152_v15  ;;  %v1346_v49 = vpop.permute.xlu0 %1345  ;;  %v1351_v50 = vpop.permute.xlu1 %1350 }
 0x4be   : > { %v1201_v54 = vmul.f32 %v1197_v51, %v1163_v18 }
 0x4bf   : > { %v1199_v56 = vmul.f32 %v1195_v52, %v1155_v22 }
 0x4c0   : > { %v1207_v57 = vpack.c.bf16 %v1201_v54, %v1200_v53 }
 0x4c1   : > { %v1206_v58 = vpack.c.bf16 %v1199_v56, %v1198_v55  ;;  %v1356_v51 = vpop.permute.xlu0 %1355  ;;  %v1361_v55 = vpop.permute.xlu1 %1360 }
 0x4c3   : > { %1740 = vmatprep.subr.bf16.mxu0 %v1206_v58 }
 0x4c4   : > { %1741 = vmatpush3.bf16.msra.mxu0 %v1206_v58 }
 0x4c5   : > { %1742 = vmatprep.subr.bf16.mxu0 %v1207_v57 }
 0x4c8   : > { %1743 = vmatpush3.bf16.msra.mxu0 %v1207_v57 }
 0x4c9   : > { %1756 = vmatprep.subr.bf16.mxu0 %v2008_v20 }
 0x4cb   : > { %1745 = vmatmul.mubr.msk.bf16.vlgmr.msra.gmra.mrb[8].mxu0 %vm979_vm2, %v1861_v59 }
 0x4cc   : > { %1760 = vmatprep.mubr.msk.bf16.mxu0 %vm2009_vm0, %v2008_v20 }
 0x59e   : > { %v1746_v0 = vpop.f32.mrb[8].mxu0 }
 0x59f   : > { %v1291_v1 = vadd.f32 %v1746_v0, %v1225_v63  ;;  %v1282_v2 = vpop.f32.mrb[9].mxu0 }
 0x5a0   : > { %v1283_v4 = vadd.f32 %v1282_v2, %v1215_v61  ;;  %v1747_v5 = vpop.f32.mrb[10].mxu0 }
 0x5a1   : > { %v1299_v6 = vmul.f32 %v1291_v1, %v1291_v1  ;;  %v1294_v7 = vadd.f32 %v1747_v5, %v1230_v3  ;;  %v1285_v8 = vpop.f32.mrb[11].mxu0 }
 0x5a2   : > { %v1297_v9 = vmul.f32 %v1283_v4, %v1283_v4  ;;  %v1286_v10 = vadd.f32 %v1285_v8, %v1220_v62 }
 0x5a3   : > { %v1303_v11 = vmul.f32 %v1299_v6, %v1291_v1  ;;  %v1300_v12 = vmul.f32 %v1294_v7, %v1294_v7 }
 0x5a4   : > { %v1301_v13 = vmul.f32 %v1297_v9, %v1283_v4  ;;  %v1298_v14 = vmul.f32 %v1286_v10, %v1286_v10 }
 0x5a5   : > { %v1307_v15 = vmul.f32 0.044715, %v1303_v11  ;;  %v1304_v16 = vmul.f32 %v1300_v12, %v1294_v7 }
 0x5a6   : > { %v1305_v17 = vmul.f32 0.044715, %v1301_v13  ;;  %v1302_v18 = vmul.f32 %v1298_v14, %v1286_v10 }
 0x5a7   : > { %v1311_v19 = vadd.f32 %v1307_v15, %v1291_v1  ;;  %v1308_v21 = vmul.f32 0.044715, %v1304_v16 }
 0x5a8   : > { %v1309_v22 = vadd.f32 %v1305_v17, %v1283_v4  ;;  %v1306_v23 = vmul.f32 0.044715, %v1302_v18 }
 0x5a9   : > { %v1315_v24 = vmul.f32 0.7978846, %v1311_v19  ;;  %v1312_v25 = vadd.f32 %v1308_v21, %v1294_v7 }
 0x5aa   : > { %v1313_v26 = vmul.f32 0.7978846, %v1309_v22  ;;  %v1310_v27 = vadd.f32 %v1306_v23, %v1286_v10 }
 0x5ab   : > { %1892 = vtanh.f32 %v1315_v24  ;;  %v1316_v28 = vmul.f32 0.7978846, %v1312_v25 }
 0x5ac   : > { %1894 = vtanh.f32 %v1313_v26  ;;  %v1314_v29 = vmul.f32 0.7978846, %v1310_v27 }
 0x5ad   : > { %1896 = vtanh.f32 %v1316_v28 }
 0x5ae   : > { %1898 = vtanh.f32 %v1314_v29 }
 0x5b5   : > { %v1893_v30 = vpop.eup %1892 }
 0x5b6   : > { %v1895_v31 = vpop.eup %1894  ;;  %v1323_v32 = vadd.f32 1.0, %v1893_v30 }
 0x5b7   : > { %v1897_v33 = vpop.eup %1896  ;;  %v1321_v34 = vadd.f32 1.0, %v1895_v31 }
 0x5b8   : > { %v1899_v35 = vpop.eup %1898  ;;  %v1324_v36 = vadd.f32 1.0, %v1897_v33  ;;  %v1327_v37 = vmul.f32 0.5, %v1323_v32 }
 0x5b9   : > { %v1322_v38 = vadd.f32 1.0, %v1899_v35  ;;  %v1325_v39 = vmul.f32 0.5, %v1321_v34 }
 0x5ba   : > { %v1328_v40 = vmul.f32 0.5, %v1324_v36  ;;  %v1331_v42 = vmul.f32 %v1327_v37, %v1291_v1  ;;  %v1464_v36 = vld [vmem:[%s2449_s21] sm:$0x3]  ;;  %v1471_v37 = vpop.permute.xlu0 %1470 }
 0x5bb   : > { %v1326_v41 = vmul.f32 0.5, %v1322_v38  ;;  %v1329_v44 = vmul.f32 %v1325_v39, %v1283_v4 }
 0x5bc   : > { %v1332_v43 = vmul.f32 %v1328_v40, %v1294_v7 }
 0x5bd   : > { %v1330_v45 = vmul.f32 %v1326_v41, %v1286_v10 }
 0x5be   : > { %v1338_v46 = vpack.c.bf16 %v1332_v43, %v1331_v42 }
 0x5bf   : > { %v1337_v47 = vpack.c.bf16 %v1330_v45, %v1329_v44 }
 0x5c1   : > { %1748 = vmatprep.subr.bf16.mxu1 %v1337_v47 }
 0x5c2   : > { %1749 = vmatpush3.bf16.msra.mxu1 %v1337_v47 }
 0x5c3   : > { %1750 = vmatprep.subr.bf16.mxu1 %v1338_v46 }
 0x5c6   : > { %1751 = vmatpush3.bf16.msra.mxu1 %v1338_v46 }
 0x5c9   : > { %1753 = vmatmul.mubr.msk.bf16.vlgmr.msra.gmra.mrb[8].mxu1 %vm979_vm2, %v1863_v48 }
 0x69c   : > { %v1754_v52 = vpop.f32.mrb[8].mxu1 }
 0x69d   : > { %v1422_v53 = vadd.f32 %v1754_v52, %v1356_v51  ;;  %v1413_v54 = vpop.f32.mrb[9].mxu1 }
 0x69e   : > { %v1414_v56 = vadd.f32 %v1413_v54, %v1346_v49  ;;  %v1755_v57 = vpop.f32.mrb[10].mxu1 }
 0x69f   : > { %v1430_v58 = vmul.f32 %v1422_v53, %v1422_v53  ;;  %v1425_v59 = vadd.f32 %v1755_v57, %v1361_v55  ;;  %v1416_v60 = vpop.f32.mrb[11].mxu1 }
 0x6a0   : > { %v1428_v61 = vmul.f32 %v1414_v56, %v1414_v56  ;;  %v1417_v62 = vadd.f32 %v1416_v60, %v1351_v50 }
 0x6a1   : > { %v1434_v63 = vmul.f32 %v1430_v58, %v1422_v53  ;;  %v1431_v0 = vmul.f32 %v1425_v59, %v1425_v59 }
 0x6a2   : > { %v1432_v1 = vmul.f32 %v1428_v61, %v1414_v56  ;;  %v1429_v2 = vmul.f32 %v1417_v62, %v1417_v62 }
 0x6a3   : > { %v1438_v3 = vmul.f32 0.044715, %v1434_v63  ;;  %v1435_v4 = vmul.f32 %v1431_v0, %v1425_v59 }
 0x6a4   : > { %v1436_v5 = vmul.f32 0.044715, %v1432_v1  ;;  %v1433_v6 = vmul.f32 %v1429_v2, %v1417_v62 }
 0x6a5   : > { %v1442_v7 = vadd.f32 %v1438_v3, %v1422_v53  ;;  %v1439_v8 = vmul.f32 0.044715, %v1435_v4 }
 0x6a6   : > { %v1440_v9 = vadd.f32 %v1436_v5, %v1414_v56  ;;  %v1437_v10 = vmul.f32 0.044715, %v1433_v6 }
 0x6a7   : > { %v1446_v11 = vmul.f32 0.7978846, %v1442_v7  ;;  %v1443_v12 = vadd.f32 %v1439_v8, %v1425_v59 }
 0x6a8   : > { %v1444_v13 = vmul.f32 0.7978846, %v1440_v9  ;;  %v1441_v14 = vadd.f32 %v1437_v10, %v1417_v62 }
 0x6a9   : > { %1900 = vtanh.f32 %v1446_v11  ;;  %v1447_v15 = vmul.f32 0.7978846, %v1443_v12 }
 0x6aa   : > { %1902 = vtanh.f32 %v1444_v13  ;;  %v1445_v16 = vmul.f32 0.7978846, %v1441_v14 }
 0x6ab   : > { %1904 = vtanh.f32 %v1447_v15 }
 0x6ac   : > { %1906 = vtanh.f32 %v1445_v16 }
 0x6b3   : > { %v1901_v17 = vpop.eup %1900 }
 0x6b4   : > { %v1903_v18 = vpop.eup %1902  ;;  %v1454_v19 = vadd.f32 1.0, %v1901_v17 }
 0x6b5   : > { %v1905_v21 = vpop.eup %1904  ;;  %v1452_v22 = vadd.f32 1.0, %v1903_v18 }
 0x6b6   : > { %v1907_v23 = vpop.eup %1906  ;;  %v1458_v24 = vmul.f32 0.5, %v1454_v19  ;;  %v1455_v25 = vadd.f32 1.0, %v1905_v21 }
 0x6b7   : > { %v1456_v26 = vmul.f32 0.5, %v1452_v22  ;;  %v1453_v27 = vadd.f32 1.0, %v1907_v23 }
 0x6b8   : > { %v1459_v28 = vmul.f32 0.5, %v1455_v25  ;;  %v1462_v30 = vmul.f32 %v1458_v24, %v1422_v53 }
 0x6b9   : > { %v1457_v29 = vmul.f32 0.5, %v1453_v27  ;;  %v1460_v32 = vmul.f32 %v1456_v26, %v1414_v56 }
 0x6ba   : > { %v1463_v31 = vmul.f32 %v1459_v28, %v1425_v59 }
 0x6bb   : > { %v1461_v33 = vmul.f32 %v1457_v29, %v1417_v62 }
 0x6bc   : > { %v1466_v34 = vpack.c.bf16 %v1463_v31, %v1462_v30 }
 0x6bd   : > { %v1465_v35 = vpack.c.bf16 %v1461_v33, %v1460_v32 }
 0x6bf   : > { %1757 = vmatpush3.bf16.msra.mxu0 %v1465_v35 }
 0x6c0   : > { %1758 = vmatprep.subr.bf16.mxu0 %v2008_v20 }
 0x6c3   : > { %1759 = vmatpush3.bf16.msra.mxu0 %v1466_v34 }
 0x6c6   : > { %1761 = vmatmul.mubr.msk.bf16.vlgmr.msra.gmra.mrb[12].mxu0 %vm979_vm2, %v1464_v36 }
 0x799   : > { %v1510_v38 = vpop.f32.mrb[12].mxu0 }
 0x79a   : > { %v1511_v39 = vadd.f32 %v1510_v38, %v1471_v37  ;;  %v1762_v40 = vpop.f32.mrb[13].mxu0 }
 0x79b   : > { %v1513_v41 = vpop.f32.mrb[14].mxu0 }
 0x79c   : > { %v1516_v42 = vmul.f32 %v1511_v39, %v1511_v39  ;;  %v1763_v43 = vpop.f32.mrb[15].mxu0 }
 0x79e   : > { %v1517_v44 = vmul.f32 %v1516_v42, %v1511_v39 }
 0x7a0   : > { %v1518_v45 = vmul.f32 0.044715, %v1517_v44 }
 0x7a2   : > { %v1519_v20 = vadd.f32 %v1518_v45, %v1511_v39 }
 0x7a4   : > { %v1520_v46 = vmul.f32 0.7978846, %v1519_v20 }
 0x7a6   : > { %1908 = vtanh.f32 %v1520_v46 }
 0x7b0   : > { %v1909_v47 = vpop.eup %1908 }
 0x7b1   : > { %v1522_v48 = vadd.f32 1.0, %v1909_v47 }
 0x7b3   : > { %v1523_v49 = vmul.f32 0.5, %v1522_v48 }
 0x7b5   : > { %v1524_v50 = vmul.f32 %v1523_v49, %v1511_v39 }
 0x7b7   : > { %1525 = vst [vmem:[%s659_s24] sm:$0xf] %v1524_v50 }
 0x7b8   : > { %1923 = shalt.err (!%p1920_p11)
}
 0x7b9   : > { %s1924_s16 = scalar_lea.hbm %s2341_s5, 64  ;;  %s1928_s25 = scalar_lea.hbm %s2451_s4, 256 }
 0x7ba   : > { %p1925_p12 = scmp.ne.s32.totalorder %s2341_s5, %s1924_s16  ;;  %p1929_p1 = scmp.lt.u32.totalorder %s2341_s5, %s2451_s4 }
 0x7bb   : > { %p1930_p2 = scmp.lt.u32.totalorder %s1928_s25, %s1924_s16  ;;  %p1932_p4 = scmp.lt.u32.totalorder %s1924_s16, %s2341_s5 }
 0x7bc   : > { %p1926_p13 = pnand %p1925_p12, %p2166_p8 }
 0x7bd   : > { %p1931_p3 = por %p1930_p2, %p1929_p1 }
 0x7be   : > { %p1927_p0 = pneg %p1926_p13 }
 0x7bf   : > { %p1933_p5 = por %p1932_p4, %p1931_p3 }
 0x7c1   : > { %p1934_p6 = pnand %p1933_p5, %p1927_p0 }
 0x7c3   : > { %1937 = shalt.err (!%p1934_p6)
}
 0x7c4   : > { %1764 = dma.vmem_to_hbm [thread:$0]  (%p2166_p8), %s2343_s14, 64, %s2341_s5, %s1527_s0  }
 0x7c5 PF: > { %s2452_s30 = sld [smem:[#allocation6_spill]]  ;;  %p1770_p7 = scmp.ge.s32.totalorder %s2004_s20, 2 }
 0x7c7   : > { %p1767_p10 = pnand %p1770_p7, %p2170_p9 }
 0x7cb   : > { %s1554_s3 = sand.u32 1, %s2452_s30  }
 0x7cc   : > { %s1555_s2 = scalar_lea.sflag [#allocation4], %s1554_s3 }
 0x7cd   : > { %1971 = dma.done.wait (!%p1767_p10), %s1555_s2, 64  }
 0x7ce   : > { %1973 = vsyncadd (!%p1767_p10), %s1555_s2, 4294967232  ;;  %s31_s20 = sadd.s32 1, %s2004_s20   ;;  %s2454_s5 = sld [smem:[#allocation7_spill]] }
 0x7cf   : > { %p28_p11 = scmp.ge.s32.totalorder %s31_s20, 6   ;;  %s2455_s18 = sld [smem:[#allocation8_spill]] }
 0x7d0   : > { %s2456_s27 = smov %s1980_s28  ;;  %s2457_s28 = smov %s1984_s29 }
 0x7d1   : > { %s2458_s29 = smov %s2178_s12  ;;  %s2459_s30 = smov %s1996_s19 }
 0x7d2   : > { %s2460_s0 = smov %s2000_s1  ;;  %30 = sbr.rel (!%p28_p11) target bundleno = 16 (0x10), region = 176 }
 0x7d4   : > { %s2461_s19 = smov %s2454_s5 }
 0x7d5   : > { %s2462_s1 = smov %s2455_s18 }
 0x7d9   :  { %1560 = vsyncpa [#allocation4], 1 }
 0x7da   :  { %1562 = vsyncpa [#allocation4 + $0x1], 1 }

</bundles_post_ra>
